<compile_context>
chip_gen: v6e
topology: v6e:2x2x1
jax: 0.10.0
libtpu: 0.0.40
codegen_flags: <defaults>
</compile_context>

<pallas_src>
import functools

import jax
import jax.numpy as jnp
import numpy as np
from jax.experimental import pallas as pl
from jax.experimental.pallas import tpu as pltpu

COMPUTE_DTYPE = jnp.bfloat16


def _round_up(x, m):
    return (x + m - 1) // m * m


def _pick_tiles(m, base, max_tile):
    """Return (padded_extent, tile) with tile | padded_extent, both multiples of base."""
    mp = _round_up(m, base)
    if mp <= max_tile:
        return mp, mp
    mp = _round_up(mp, max_tile)
    return mp, max_tile


# ----------------------------------------------------------------------------
# Pallas kernels
# ----------------------------------------------------------------------------
def _conv_relu_pool_kernel(w_ref, p_ref, b_ref, o_ref):
    """Fused conv-as-matmul + bias + ReLU + 2x2 max-pool, transposed layout.

    w_ref: (Cp, Kp)        bf16   weights (Cout rows padded, K = Cin*kh*kw)
    p_ref: (4, Kp, tm)     bf16   im2col patches, one slab per pool-window corner
    b_ref: (Cp, 1)         f32    bias (broadcast over lanes)
    o_ref: (Cp, tm)        f32    pooled activations, lanes = (n, hp, wp)
    """
    w = w_ref[...]
    s = jnp.dot(w, p_ref[0], preferred_element_type=jnp.float32)
    for c in (1, 2, 3):
        s = jnp.maximum(s, jnp.dot(w, p_ref[c], preferred_element_type=jnp.float32))
    # max_c relu(s_c + b) == relu(max_c(s_c) + b)  (monotonicity)
    o_ref[...] = jnp.maximum(s + b_ref[...], 0.0)


def _fc_fused_kernel(x_ref, w1_ref, b1_ref, w2_ref, b2_ref, w3_ref, b3_ref,
                     o_ref, *, compute_dtype):
    """fc1 + ReLU -> fc2 + ReLU -> fc3, all in one kernel; intermediates stay on-chip."""
    h = jnp.dot(x_ref[...], w1_ref[...], preferred_element_type=jnp.float32)
    h = jnp.maximum(h + b1_ref[...], 0.0).astype(compute_dtype)
    h = jnp.dot(h, w2_ref[...], preferred_element_type=jnp.float32)
    h = jnp.maximum(h + b2_ref[...], 0.0).astype(compute_dtype)
    o_ref[...] = (jnp.dot(h, w3_ref[...], preferred_element_type=jnp.float32)
                  + b3_ref[...])


# ----------------------------------------------------------------------------
# Wrappers
# ----------------------------------------------------------------------------
def conv_relu_pool(x, w_pad, b_pad, cout, kh=5, kw=5, *, max_tile=512):
    """Valid conv (stride 1) + bias + ReLU + 2x2/2 max-pool. x: NCHW float32.

    Lowered to (Cp, M) = W @ patches^T with M = N*Hp*Wp lane-dense; the four
    pool-window corners are separate patch slabs max-reduced inside the kernel.
    """
    N, C, H, W = x.shape
    Ho, Wo = H - kh + 1, W - kw + 1
    Hp, Wp = Ho // 2, Wo // 2
    M = N * Hp * Wp
    K = C * kh * kw
    Cp, Kp = w_pad.shape
    Mq, tm = _pick_tiles(M, 128, max_tile)

    # Pool-fused, transposed im2col: one (K, M) slab per pool-window corner,
    # K ordered (Cin, kh, kw) to match w.reshape(Cout, Cin*kh*kw).
    corners = []
    for di in (0, 1):
        for dj in (0, 1):
            vs = [x[:, :, di + ki: di + ki + 2 * Hp: 2,
                       dj + kj: dj + kj + 2 * Wp: 2]
                  for ki in range(kh) for kj in range(kw)]          # (N,C,Hp,Wp) each
            p = jnp.stack(vs, axis=2)                               # (N, C, kh*kw, Hp, Wp)
            p = p.transpose(1, 2, 0, 3, 4).reshape(K, M)            # (K, N*Hp*Wp)
            corners.append(p)
    patches = jnp.stack(corners, axis=0).astype(COMPUTE_DTYPE)      # (4, K, M)
    patches = jnp.zeros((4, Kp, Mq), COMPUTE_DTYPE).at[:, :K, :M].set(patches)

    out = pl.pallas_call(
        _conv_relu_pool_kernel,
        out_shape=jax.ShapeDtypeStruct((Cp, Mq), jnp.float32),
        grid=(Mq // tm,),
        in_specs=[pl.BlockSpec((Cp, Kp), lambda i: (0, 0)),          # weights (resident)
                  pl.BlockSpec((4, Kp, tm), lambda i: (0, 0, i)),    # patch tile
                  pl.BlockSpec((Cp, 1), lambda i: (0, 0))],          # bias
        out_specs=pl.BlockSpec((Cp, tm), lambda i: (0, i)),
        compiler_params=pltpu.CompilerParams(
            dimension_semantics=("parallel",)),
    )(w_pad, patches, b_pad)

    # (Cout, N, Hp, Wp) -> NCHW
    return out[:cout, :M].reshape(cout, N, Hp, Wp).transpose(1, 0, 2, 3)


def fc_stack(x, w1, b1, w2, b2, w3, b3, num_classes, *, max_tile=256):
    """Fused fc1(ReLU) -> fc2(ReLU) -> fc3 on (N, 400) activations."""
    n_rows, k_in = x.shape
    k_fc = w1.shape[0]
    h1, h2, h3 = w1.shape[1], w2.shape[1], w3.shape[1]
    mp, tm = _pick_tiles(n_rows, 16, max_tile)

    xp = jnp.zeros((mp, k_fc), COMPUTE_DTYPE).at[:n_rows, :k_in].set(
        x.astype(COMPUTE_DTYPE))

    out = pl.pallas_call(
        functools.partial(_fc_fused_kernel, compute_dtype=COMPUTE_DTYPE),
        out_shape=jax.ShapeDtypeStruct((mp, h3), jnp.float32),
        grid=(mp // tm,),
        in_specs=[pl.BlockSpec((tm, k_fc), lambda i: (i, 0)),
                  pl.BlockSpec((k_fc, h1), lambda i: (0, 0)),
                  pl.BlockSpec((1, h1), lambda i: (0, 0)),
                  pl.BlockSpec((h1, h2), lambda i: (0, 0)),
                  pl.BlockSpec((1, h2), lambda i: (0, 0)),
                  pl.BlockSpec((h2, h3), lambda i: (0, 0)),
                  pl.BlockSpec((1, h3), lambda i: (0, 0))],
        out_specs=pl.BlockSpec((tm, h3), lambda i: (i, 0)),
        compiler_params=pltpu.CompilerParams(
            dimension_semantics=("parallel",)),
    )(xp, w1, b1, w2, b2, w3, b3)
    return out[:n_rows, :num_classes]


# ----------------------------------------------------------------------------
# Parameters
# ----------------------------------------------------------------------------
def init_params(key, num_classes=11):
    """PyTorch-style (out, in) weights with U(-1/sqrt(fan_in), ...) init."""
    ks = jax.random.split(key, 10)

    def uni(k, shape, fan_in):
        bound = 1.0 / np.sqrt(fan_in)
        return jax.random.uniform(k, shape, jnp.float32, -bound, bound)

    return {
        "conv1_w": uni(ks[0], (6, 3, 5, 5), 3 * 5 * 5),
        "conv1_b": uni(ks[1], (6,), 3 * 5 * 5),
        "conv2_w": uni(ks[2], (16, 6, 5, 5), 6 * 5 * 5),
        "conv2_b": uni(ks[3], (16,), 6 * 5 * 5),
        "fc1_w": uni(ks[4], (120, 16 * 5 * 5), 16 * 5 * 5),
        "fc1_b": uni(ks[5], (120,), 16 * 5 * 5),
        "fc2_w": uni(ks[6], (84, 120), 120),
        "fc2_b": uni(ks[7], (84,), 120),
        "fc3_w": uni(ks[8], (num_classes, 84), 84),
        "fc3_b": uni(ks[9], (num_classes,), 84),
    }


def prepare_params(p):
    """One-time pad / transpose / cast of all weights into kernel-ready layouts."""
    def pad2(a, rows, cols, dtype):
        out = jnp.zeros((rows, cols), dtype)
        return out.at[:a.shape[0], :a.shape[1]].set(a.astype(dtype))

    c1w = p["conv1_w"].reshape(6, -1)                      # (6, 75)
    c2w = p["conv2_w"].reshape(16, -1)                     # (16, 150)
    return {
        "c1_w": pad2(c1w, 16, _round_up(c1w.shape[1], 128), COMPUTE_DTYPE),
        "c1_b": pad2(p["conv1_b"][:, None], 16, 1, jnp.float32),
        "c2_w": pad2(c2w, 16, _round_up(c2w.shape[1], 128), COMPUTE_DTYPE),
        "c2_b": pad2(p["conv2_b"][:, None], 16, 1, jnp.float32),
        "fc1_w": pad2(p["fc1_w"].T, _round_up(16 * 5 * 5, 128), 128, COMPUTE_DTYPE),
        "fc1_b": pad2(p["fc1_b"][None, :], 1, 128, jnp.float32),
        "fc2_w": pad2(p["fc2_w"].T, 128, 128, COMPUTE_DTYPE),
        "fc2_b": pad2(p["fc2_b"][None, :], 1, 128, jnp.float32),
        "fc3_w": pad2(p["fc3_w"].T, 128, 128, COMPUTE_DTYPE),
        "fc3_b": pad2(p["fc3_b"][None, :], 1, 128, jnp.float32),
    }


# ----------------------------------------------------------------------------
# FoodNet forward
# ----------------------------------------------------------------------------
def foodnet_forward(x, pp, num_classes=11):
    x = conv_relu_pool(x, pp["c1_w"], pp["c1_b"], cout=6)     # (N, 6, 14, 14)
    x = conv_relu_pool(x, pp["c2_w"], pp["c2_b"], cout=16)    # (N, 16, 5, 5)
    x = x.reshape(x.shape[0], 16 * 5 * 5)                     # matches torch .view
    return fc_stack(x, pp["fc1_w"], pp["fc1_b"], pp["fc2_w"], pp["fc2_b"],
                    pp["fc3_w"], pp["fc3_b"], num_classes)


def reference_forward(x, p):
    """Pure-JAX float32 reference for correctness check."""
    def conv(x, w, b):
        y = jax.lax.conv_general_dilated(
            x, w, (1, 1), "VALID", dimension_numbers=("NCHW", "OIHW", "NCHW"))
        return jax.nn.relu(y + b[None, :, None, None])

    def pool(x):
        return jax.lax.reduce_window(x, -jnp.inf, jax.lax.max,
                                     (1, 1, 2, 2), (1, 1, 2, 2), "VALID")

    x = pool(conv(x, p["conv1_w"], p["conv1_b"]))
    x = pool(conv(x, p["conv2_w"], p["conv2_b"]))
    x = x.reshape(-1, 16 * 5 * 5)
    x = jax.nn.relu(x @ p["fc1_w"].T + p["fc1_b"])
    x = jax.nn.relu(x @ p["fc2_w"].T + p["fc2_b"])
    return x @ p["fc3_w"].T + p["fc3_b"]


if __name__ == "__main__":
    key = jax.random.PRNGKey(0)
    kx, kp = jax.random.split(key)
    # 32x32 input is required by the module's 16*5*5 flatten.
    x = jax.random.normal(kx, (2, 3, 32, 32), dtype=jnp.float32)
    params = init_params(kp)
    prepped = prepare_params(params)          # one-time weight prep (not per forward)

    fwd = jax.jit(foodnet_forward)
    out = jax.block_until_ready(fwd(x, prepped))

    assert out.shape == (2, 11), out.shape
    ref = reference_forward(x, params)
    # bf16 matmul inputs (f32 accumulation) vs f32 reference -> slightly looser tol.
    np.testing.assert_allclose(np.asarray(out), np.asarray(ref),
                               rtol=2e-2, atol=2e-2)
    print("KERNEL_OK")
</pallas_src>

<mosaic_0001>
module attributes {stable_mosaic.version = 11 : i64} {
  func.func @_conv_relu_pool_kernel(%arg0: i32, %arg1: memref<16x128xbf16, #tpu.memory_space<vmem>>, %arg2: memref<4x128x512xbf16, #tpu.memory_space<vmem>>, %arg3: memref<16x1xf32, #tpu.memory_space<vmem>>, %arg4: memref<16x512xf32, #tpu.memory_space<vmem>>) attributes {dimension_semantics = [#tpu.dimension_semantics<parallel>], iteration_bounds = array<i64: 1>, scalar_prefetch = 0 : i64, scratch_operands = 0 : i64, tpu.core_type = #tpu.core_type<tc>, window_params = [{pipeline_mode = #tpu.pipeline_mode<synchronous>, transform_indices = @transform_0, window_bounds = array<i64: 16, 128>}, {transform_indices = @transform_1, window_bounds = array<i64: 4, 128, 512>}, {pipeline_mode = #tpu.pipeline_mode<synchronous>, transform_indices = @transform_2, window_bounds = array<i64: 16, 1>}, {transform_indices = @transform_3, window_bounds = array<i64: 16, 512>}]} {
    %c0 = arith.constant 0 : index
    %c0_0 = arith.constant 0 : index
    %0 = vector.load %arg1[%c0, %c0_0] : memref<16x128xbf16, #tpu.memory_space<vmem>>, vector<16x128xbf16>
    %c0_1 = arith.constant 0 : index
    %c0_2 = arith.constant 0 : index
    %c0_3 = arith.constant 0 : index
    %1 = vector.load %arg2[%c0_1, %c0_2, %c0_3] : memref<4x128x512xbf16, #tpu.memory_space<vmem>>, vector<1x128x512xbf16>
    %2 = vector.shape_cast %1 : vector<1x128x512xbf16> to vector<128x512xbf16>
    %cst = arith.constant dense<0.000000e+00> : vector<16x512xf32>
    %3 = tpu.matmul %0, %2, %cst {dimension_numbers = #tpu.dot_dimension_numbers<[1], [0], [0], [1], [0, 0, 1, 1], [], []>} : vector<16x128xbf16>, vector<128x512xbf16>, vector<16x512xf32> -> vector<16x512xf32>
    %c1 = arith.constant 1 : index
    %c0_4 = arith.constant 0 : index
    %c0_5 = arith.constant 0 : index
    %4 = vector.load %arg2[%c1, %c0_4, %c0_5] : memref<4x128x512xbf16, #tpu.memory_space<vmem>>, vector<1x128x512xbf16>
    %5 = vector.shape_cast %4 : vector<1x128x512xbf16> to vector<128x512xbf16>
    %cst_6 = arith.constant dense<0.000000e+00> : vector<16x512xf32>
    %6 = tpu.matmul %0, %5, %cst_6 {dimension_numbers = #tpu.dot_dimension_numbers<[1], [0], [0], [1], [0, 0, 1, 1], [], []>} : vector<16x128xbf16>, vector<128x512xbf16>, vector<16x512xf32> -> vector<16x512xf32>
    %7 = arith.maximumf %3, %6 : vector<16x512xf32>
    %c2 = arith.constant 2 : index
    %c0_7 = arith.constant 0 : index
    %c0_8 = arith.constant 0 : index
    %8 = vector.load %arg2[%c2, %c0_7, %c0_8] : memref<4x128x512xbf16, #tpu.memory_space<vmem>>, vector<1x128x512xbf16>
    %9 = vector.shape_cast %8 : vector<1x128x512xbf16> to vector<128x512xbf16>
    %cst_9 = arith.constant dense<0.000000e+00> : vector<16x512xf32>
    %10 = tpu.matmul %0, %9, %cst_9 {dimension_numbers = #tpu.dot_dimension_numbers<[1], [0], [0], [1], [0, 0, 1, 1], [], []>} : vector<16x128xbf16>, vector<128x512xbf16>, vector<16x512xf32> -> vector<16x512xf32>
    %11 = arith.maximumf %7, %10 : vector<16x512xf32>
    %c3 = arith.constant 3 : index
    %c0_10 = arith.constant 0 : index
    %c0_11 = arith.constant 0 : index
    %12 = vector.load %arg2[%c3, %c0_10, %c0_11] : memref<4x128x512xbf16, #tpu.memory_space<vmem>>, vector<1x128x512xbf16>
    %13 = vector.shape_cast %12 : vector<1x128x512xbf16> to vector<128x512xbf16>
    %cst_12 = arith.constant dense<0.000000e+00> : vector<16x512xf32>
    %14 = tpu.matmul %0, %13, %cst_12 {dimension_numbers = #tpu.dot_dimension_numbers<[1], [0], [0], [1], [0, 0, 1, 1], [], []>} : vector<16x128xbf16>, vector<128x512xbf16>, vector<16x512xf32> -> vector<16x512xf32>
    %15 = arith.maximumf %11, %14 : vector<16x512xf32>
    %c0_13 = arith.constant 0 : index
    %c0_14 = arith.constant 0 : index
    %16 = vector.load %arg3[%c0_13, %c0_14] : memref<16x1xf32, #tpu.memory_space<vmem>>, vector<16x1xf32>
    %17 = vector.broadcast %16 : vector<16x1xf32> to vector<16x512xf32>
    %18 = arith.addf %15, %17 : vector<16x512xf32>
    %cst_15 = arith.constant 0.000000e+00 : f32
    %19 = vector.broadcast %cst_15 : f32 to vector<16x512xf32>
    %20 = arith.maximumf %18, %19 : vector<16x512xf32>
    %c0_16 = arith.constant 0 : index
    %c0_17 = arith.constant 0 : index
    %21 = vector.load %arg4[%c0_16, %c0_17] : memref<16x512xf32, #tpu.memory_space<vmem>>, vector<16x512xf32>
    tpu.vector_store %arg4[%c0_16, %c0_17], %20 {strides = array<i32>} : memref<16x512xf32, #tpu.memory_space<vmem>>, vector<16x512xf32>,
    return
  }
  func.func @transform_0(%arg0: i32) -> (i32, i32) {
    %c0_i32 = arith.constant 0 : i32
    %c0_i32_0 = arith.constant 0 : i32
    %c0_i32_1 = arith.constant 0 : i32
    return %c0_i32, %c0_i32_0 : i32, i32
  }
  func.func @transform_1(%arg0: i32) -> (i32, i32, i32) {
    %c0_i32 = arith.constant 0 : i32
    %c0_i32_0 = arith.constant 0 : i32
    %c0_i32_1 = arith.constant 0 : i32
    return %c0_i32, %c0_i32_0, %arg0 : i32, i32, i32
  }
  func.func @transform_2(%arg0: i32) -> (i32, i32) {
    %c0_i32 = arith.constant 0 : i32
    %c0_i32_0 = arith.constant 0 : i32
    %c0_i32_1 = arith.constant 0 : i32
    return %c0_i32, %c0_i32_0 : i32, i32
  }
  func.func @transform_3(%arg0: i32) -> (i32, i32) {
    %c0_i32 = arith.constant 0 : i32
    %c0_i32_0 = arith.constant 0 : i32
    return %c0_i32, %arg0 : i32, i32
  }
}

module attributes {stable_mosaic.version = 11 : i64} {
  func.func @_conv_relu_pool_kernel(%arg0: i32, %arg1: memref<16x256xbf16, #tpu.memory_space<vmem>>, %arg2: memref<4x256x128xbf16, #tpu.memory_space<vmem>>, %arg3: memref<16x1xf32, #tpu.memory_space<vmem>>, %arg4: memref<16x128xf32, #tpu.memory_space<vmem>>) attributes {dimension_semantics = [#tpu.dimension_semantics<parallel>], iteration_bounds = array<i64: 1>, scalar_prefetch = 0 : i64, scratch_operands = 0 : i64, tpu.core_type = #tpu.core_type<tc>, window_params = [{pipeline_mode = #tpu.pipeline_mode<synchronous>, transform_indices = @transform_0, window_bounds = array<i64: 16, 256>}, {transform_indices = @transform_1, window_bounds = array<i64: 4, 256, 128>}, {pipeline_mode = #tpu.pipeline_mode<synchronous>, transform_indices = @transform_2, window_bounds = array<i64: 16, 1>}, {transform_indices = @transform_3, window_bounds = array<i64: 16, 128>}]} {
    %c0 = arith.constant 0 : index
    %c0_0 = arith.constant 0 : index
    %0 = vector.load %arg1[%c0, %c0_0] : memref<16x256xbf16, #tpu.memory_space<vmem>>, vector<16x256xbf16>
    %c0_1 = arith.constant 0 : index
    %c0_2 = arith.constant 0 : index
    %c0_3 = arith.constant 0 : index
    %1 = vector.load %arg2[%c0_1, %c0_2, %c0_3] : memref<4x256x128xbf16, #tpu.memory_space<vmem>>, vector<1x256x128xbf16>
    %2 = vector.shape_cast %1 : vector<1x256x128xbf16> to vector<256x128xbf16>
    %cst = arith.constant dense<0.000000e+00> : vector<16x128xf32>
    %3 = tpu.matmul %0, %2, %cst {dimension_numbers = #tpu.dot_dimension_numbers<[1], [0], [0], [1], [0, 0, 1, 1], [], []>} : vector<16x256xbf16>, vector<256x128xbf16>, vector<16x128xf32> -> vector<16x128xf32>
    %c1 = arith.constant 1 : index
    %c0_4 = arith.constant 0 : index
    %c0_5 = arith.constant 0 : index
    %4 = vector.load %arg2[%c1, %c0_4, %c0_5] : memref<4x256x128xbf16, #tpu.memory_space<vmem>>, vector<1x256x128xbf16>
    %5 = vector.shape_cast %4 : vector<1x256x128xbf16> to vector<256x128xbf16>
    %cst_6 = arith.constant dense<0.000000e+00> : vector<16x128xf32>
    %6 = tpu.matmul %0, %5, %cst_6 {dimension_numbers = #tpu.dot_dimension_numbers<[1], [0], [0], [1], [0, 0, 1, 1], [], []>} : vector<16x256xbf16>, vector<256x128xbf16>, vector<16x128xf32> -> vector<16x128xf32>
    %7 = arith.maximumf %3, %6 : vector<16x128xf32>
    %c2 = arith.constant 2 : index
    %c0_7 = arith.constant 0 : index
    %c0_8 = arith.constant 0 : index
    %8 = vector.load %arg2[%c2, %c0_7, %c0_8] : memref<4x256x128xbf16, #tpu.memory_space<vmem>>, vector<1x256x128xbf16>
    %9 = vector.shape_cast %8 : vector<1x256x128xbf16> to vector<256x128xbf16>
    %cst_9 = arith.constant dense<0.000000e+00> : vector<16x128xf32>
    %10 = tpu.matmul %0, %9, %cst_9 {dimension_numbers = #tpu.dot_dimension_numbers<[1], [0], [0], [1], [0, 0, 1, 1], [], []>} : vector<16x256xbf16>, vector<256x128xbf16>, vector<16x128xf32> -> vector<16x128xf32>
    %11 = arith.maximumf %7, %10 : vector<16x128xf32>
    %c3 = arith.constant 3 : index
    %c0_10 = arith.constant 0 : index
    %c0_11 = arith.constant 0 : index
    %12 = vector.load %arg2[%c3, %c0_10, %c0_11] : memref<4x256x128xbf16, #tpu.memory_space<vmem>>, vector<1x256x128xbf16>
    %13 = vector.shape_cast %12 : vector<1x256x128xbf16> to vector<256x128xbf16>
    %cst_12 = arith.constant dense<0.000000e+00> : vector<16x128xf32>
    %14 = tpu.matmul %0, %13, %cst_12 {dimension_numbers = #tpu.dot_dimension_numbers<[1], [0], [0], [1], [0, 0, 1, 1], [], []>} : vector<16x256xbf16>, vector<256x128xbf16>, vector<16x128xf32> -> vector<16x128xf32>
    %15 = arith.maximumf %11, %14 : vector<16x128xf32>
    %c0_13 = arith.constant 0 : index
    %c0_14 = arith.constant 0 : index
    %16 = vector.load %arg3[%c0_13, %c0_14] : memref<16x1xf32, #tpu.memory_space<vmem>>, vector<16x1xf32>
    %17 = vector.broadcast %16 : vector<16x1xf32> to vector<16x128xf32>
    %18 = arith.addf %15, %17 : vector<16x128xf32>
    %cst_15 = arith.constant 0.000000e+00 : f32
    %19 = vector.broadcast %cst_15 : f32 to vector<16x128xf32>
    %20 = arith.maximumf %18, %19 : vector<16x128xf32>
    %c0_16 = arith.constant 0 : index
    %c0_17 = arith.constant 0 : index
    %21 = vector.load %arg4[%c0_16, %c0_17] : memref<16x128xf32, #tpu.memory_space<vmem>>, vector<16x128xf32>
    tpu.vector_store %arg4[%c0_16, %c0_17], %20 {strides = array<i32>} : memref<16x128xf32, #tpu.memory_space<vmem>>, vector<16x128xf32>,
    return
  }
  func.func @transform_0(%arg0: i32) -> (i32, i32) {
    %c0_i32 = arith.constant 0 : i32
    %c0_i32_0 = arith.constant 0 : i32
    %c0_i32_1 = arith.constant 0 : i32
    return %c0_i32, %c0_i32_0 : i32, i32
  }
  func.func @transform_1(%arg0: i32) -> (i32, i32, i32) {
    %c0_i32 = arith.constant 0 : i32
    %c0_i32_0 = arith.constant 0 : i32
    %c0_i32_1 = arith.constant 0 : i32
    return %c0_i32, %c0_i32_0, %arg0 : i32, i32, i32
  }
  func.func @transform_2(%arg0: i32) -> (i32, i32) {
    %c0_i32 = arith.constant 0 : i32
    %c0_i32_0 = arith.constant 0 : i32
    %c0_i32_1 = arith.constant 0 : i32
    return %c0_i32, %c0_i32_0 : i32, i32
  }
  func.func @transform_3(%arg0: i32) -> (i32, i32) {
    %c0_i32 = arith.constant 0 : i32
    %c0_i32_0 = arith.constant 0 : i32
    return %c0_i32, %arg0 : i32, i32
  }
}

module attributes {stable_mosaic.version = 11 : i64} {
  func.func @_fc_fused_kernel(%arg0: i32, %arg1: memref<16x512xbf16, #tpu.memory_space<vmem>>, %arg2: memref<512x128xbf16, #tpu.memory_space<vmem>>, %arg3: memref<1x128xf32, #tpu.memory_space<vmem>>, %arg4: memref<128x128xbf16, #tpu.memory_space<vmem>>, %arg5: memref<1x128xf32, #tpu.memory_space<vmem>>, %arg6: memref<128x128xbf16, #tpu.memory_space<vmem>>, %arg7: memref<1x128xf32, #tpu.memory_space<vmem>>, %arg8: memref<16x128xf32, #tpu.memory_space<vmem>>) attributes {dimension_semantics = [#tpu.dimension_semantics<parallel>], iteration_bounds = array<i64: 1>, scalar_prefetch = 0 : i64, scratch_operands = 0 : i64, tpu.core_type = #tpu.core_type<tc>, window_params = [{transform_indices = @transform_0, window_bounds = array<i64: 16, 512>}, {pipeline_mode = #tpu.pipeline_mode<synchronous>, transform_indices = @transform_1, window_bounds = array<i64: 512, 128>}, {pipeline_mode = #tpu.pipeline_mode<synchronous>, transform_indices = @transform_2, window_bounds = array<i64: 1, 128>}, {pipeline_mode = #tpu.pipeline_mode<synchronous>, transform_indices = @transform_3, window_bounds = array<i64: 128, 128>}, {pipeline_mode = #tpu.pipeline_mode<synchronous>, transform_indices = @transform_4, window_bounds = array<i64: 1, 128>}, {pipeline_mode = #tpu.pipeline_mode<synchronous>, transform_indices = @transform_5, window_bounds = array<i64: 128, 128>}, {pipeline_mode = #tpu.pipeline_mode<synchronous>, transform_indices = @transform_6, window_bounds = array<i64: 1, 128>}, {transform_indices = @transform_7, window_bounds = array<i64: 16, 128>}]} {
    %c0 = arith.constant 0 : index
    %c0_0 = arith.constant 0 : index
    %0 = vector.load %arg1[%c0, %c0_0] : memref<16x512xbf16, #tpu.memory_space<vmem>>, vector<16x512xbf16>
    %c0_1 = arith.constant 0 : index
    %c0_2 = arith.constant 0 : index
    %1 = vector.load %arg2[%c0_1, %c0_2] : memref<512x128xbf16, #tpu.memory_space<vmem>>, vector<512x128xbf16>
    %cst = arith.constant dense<0.000000e+00> : vector<16x128xf32>
    %2 = tpu.matmul %0, %1, %cst {dimension_numbers = #tpu.dot_dimension_numbers<[1], [0], [0], [1], [0, 0, 1, 1], [], []>} : vector<16x512xbf16>, vector<512x128xbf16>, vector<16x128xf32> -> vector<16x128xf32>
    %c0_3 = arith.constant 0 : index
    %c0_4 = arith.constant 0 : index
    %3 = vector.load %arg3[%c0_3, %c0_4] : memref<1x128xf32, #tpu.memory_space<vmem>>, vector<1x128xf32>
    %4 = vector.broadcast %3 : vector<1x128xf32> to vector<16x128xf32>
    %5 = arith.addf %2, %4 : vector<16x128xf32>
    %cst_5 = arith.constant 0.000000e+00 : f32
    %6 = vector.broadcast %cst_5 : f32 to vector<16x128xf32>
    %7 = arith.maximumf %5, %6 : vector<16x128xf32>
    %8 = arith.truncf %7 : vector<16x128xf32> to vector<16x128xbf16>
    %c0_6 = arith.constant 0 : index
    %c0_7 = arith.constant 0 : index
    %9 = vector.load %arg4[%c0_6, %c0_7] : memref<128x128xbf16, #tpu.memory_space<vmem>>, vector<128x128xbf16>
    %cst_8 = arith.constant dense<0.000000e+00> : vector<16x128xf32>
    %10 = tpu.matmul %8, %9, %cst_8 {dimension_numbers = #tpu.dot_dimension_numbers<[1], [0], [0], [1], [0, 0, 1, 1], [], []>} : vector<16x128xbf16>, vector<128x128xbf16>, vector<16x128xf32> -> vector<16x128xf32>
    %c0_9 = arith.constant 0 : index
    %c0_10 = arith.constant 0 : index
    %11 = vector.load %arg5[%c0_9, %c0_10] : memref<1x128xf32, #tpu.memory_space<vmem>>, vector<1x128xf32>
    %12 = vector.broadcast %11 : vector<1x128xf32> to vector<16x128xf32>
    %13 = arith.addf %10, %12 : vector<16x128xf32>
    %cst_11 = arith.constant 0.000000e+00 : f32
    %14 = vector.broadcast %cst_11 : f32 to vector<16x128xf32>
    %15 = arith.maximumf %13, %14 : vector<16x128xf32>
    %16 = arith.truncf %15 : vector<16x128xf32> to vector<16x128xbf16>
    %c0_12 = arith.constant 0 : index
    %c0_13 = arith.constant 0 : index
    %17 = vector.load %arg6[%c0_12, %c0_13] : memref<128x128xbf16, #tpu.memory_space<vmem>>, vector<128x128xbf16>
    %cst_14 = arith.constant dense<0.000000e+00> : vector<16x128xf32>
    %18 = tpu.matmul %16, %17, %cst_14 {dimension_numbers = #tpu.dot_dimension_numbers<[1], [0], [0], [1], [0, 0, 1, 1], [], []>} : vector<16x128xbf16>, vector<128x128xbf16>, vector<16x128xf32> -> vector<16x128xf32>
    %c0_15 = arith.constant 0 : index
    %c0_16 = arith.constant 0 : index
    %19 = vector.load %arg7[%c0_15, %c0_16] : memref<1x128xf32, #tpu.memory_space<vmem>>, vector<1x128xf32>
    %20 = vector.broadcast %19 : vector<1x128xf32> to vector<16x128xf32>
    %21 = arith.addf %18, %20 : vector<16x128xf32>
    %c0_17 = arith.constant 0 : index
    %c0_18 = arith.constant 0 : index
    %22 = vector.load %arg8[%c0_17, %c0_18] : memref<16x128xf32, #tpu.memory_space<vmem>>, vector<16x128xf32>
    tpu.vector_store %arg8[%c0_17, %c0_18], %21 {strides = array<i32>} : memref<16x128xf32, #tpu.memory_space<vmem>>, vector<16x128xf32>,
    return
  }
  func.func @transform_0(%arg0: i32) -> (i32, i32) {
    %c0_i32 = arith.constant 0 : i32
    %c0_i32_0 = arith.constant 0 : i32
    return %arg0, %c0_i32 : i32, i32
  }
  func.func @transform_1(%arg0: i32) -> (i32, i32) {
    %c0_i32 = arith.constant 0 : i32
    %c0_i32_0 = arith.constant 0 : i32
    %c0_i32_1 = arith.constant 0 : i32
    return %c0_i32, %c0_i32_0 : i32, i32
  }
  func.func @transform_2(%arg0: i32) -> (i32, i32) {
    %c0_i32 = arith.constant 0 : i32
    %c0_i32_0 = arith.constant 0 : i32
    %c0_i32_1 = arith.constant 0 : i32
    return %c0_i32, %c0_i32_0 : i32, i32
  }
  func.func @transform_3(%arg0: i32) -> (i32, i32) {
    %c0_i32 = arith.constant 0 : i32
    %c0_i32_0 = arith.constant 0 : i32
    %c0_i32_1 = arith.constant 0 : i32
    return %c0_i32, %c0_i32_0 : i32, i32
  }
  func.func @transform_4(%arg0: i32) -> (i32, i32) {
    %c0_i32 = arith.constant 0 : i32
    %c0_i32_0 = arith.constant 0 : i32
    %c0_i32_1 = arith.constant 0 : i32
    return %c0_i32, %c0_i32_0 : i32, i32
  }
  func.func @transform_5(%arg0: i32) -> (i32, i32) {
    %c0_i32 = arith.constant 0 : i32
    %c0_i32_0 = arith.constant 0 : i32
    %c0_i32_1 = arith.constant 0 : i32
    return %c0_i32, %c0_i32_0 : i32, i32
  }
  func.func @transform_6(%arg0: i32) -> (i32, i32) {
    %c0_i32 = arith.constant 0 : i32
    %c0_i32_0 = arith.constant 0 : i32
    %c0_i32_1 = arith.constant 0 : i32
    return %c0_i32, %c0_i32_0 : i32, i32
  }
  func.func @transform_7(%arg0: i32) -> (i32, i32) {
    %c0_i32 = arith.constant 0 : i32
    %c0_i32_0 = arith.constant 0 : i32
    return %arg0, %c0_i32 : i32, i32
  }
}

</mosaic_0001>

<bundles_post_ra>
// kernel: foodnet_forward.3
= control target key start
LH: loop header
LB: loop body
LE: loop exit
PB: predicated region body
PF: predicated region fallthrough
CT: control target
= control target key end

     0   :  { %v1622_v1 = vmov 0   ;;  %s2079_s1 = inlined_call_operand.vmem [shape: bf16[4,128,512], index: 1, kind: input, shape index: {}]   ;;  %s2080_s0 = inlined_call_operand.vmem [shape: bf16[16,128], index: 0, kind: input, shape index: {}]   ;;  %s2081_s2 = inlined_call_operand.vmem [shape: f32[16,1], index: 2, kind: input, shape index: {}]   ;;  %s2082_s3 = inlined_call_operand.vmem [shape: f32[16,512], index: 3, kind: output, shape index: {}]  }
   0x1   :  { %v1429_v0 = vld [vmem:[%s2079_s1 + $0xe4] ss:$16 sps:$4 sm:$0xff]   ;;  %247 = vmatprep.mubr.bf16.mxu0 %v1622_v1  ;;  %290 = vmatprep.mubr.bf16.mxu1 %v1622_v1  ;;  %v1431_v2 = vld [vmem:[%s2079_s1 + $0xec] ss:$16 sps:$4 sm:$0xff]   ;;  %v1433_v3 = vld [vmem:[%s2079_s1 + $0xe0] ss:$16 sps:$4 sm:$0xff]  }
   0x2   :  { %1428 = vset.pattern.permute.xlu0 %v1622_v1  ;;  %215 = vmatprep.subr.bf16.mxu0 %v1429_v0  ;;  %v1434_v4 = vld [vmem:[%s2079_s1 + $0xe8] ss:$16 sps:$4 sm:$0xff]   ;;  %v1435_v5 = vld [vmem:[%s2079_s1 + $0xc4] ss:$16 sps:$4 sm:$0xff]   ;;  %v1437_v6 = vld [vmem:[%s2079_s1 + $0xcc] ss:$16 sps:$4 sm:$0xff]  }
   0x3   :  { %258 = vmatprep.subr.bf16.mxu1 %v1431_v2  ;;  %216 = vmatpush1.bf16.msra.mxu0 %v1433_v3  ;;  %v1439_v7 = vld [vmem:[%s2079_s1 + $0xc0] ss:$16 sps:$4 sm:$0xff]   ;;  %v1440_v8 = vld [vmem:[%s2079_s1 + $0xc8] ss:$16 sps:$4 sm:$0xff]   ;;  %v1441_v9 = vld [vmem:[%s2079_s1 + $0xa4] ss:$16 sps:$4 sm:$0xff]  }
   0x4   :  { %259 = vmatpush1.bf16.msra.mxu1 %v1434_v4  ;;  %217 = vmatprep.subr.bf16.mxu0 %v1435_v5  ;;  %v1443_v10 = vld [vmem:[%s2079_s1 + $0xac] ss:$16 sps:$4 sm:$0xff]   ;;  %v1445_v11 = vld [vmem:[%s2079_s1 + $0xa0] ss:$16 sps:$4 sm:$0xff]   ;;  %v1446_v12 = vld [vmem:[%s2079_s1 + $0xa8] ss:$16 sps:$4 sm:$0xff]  }
   0x5   :  { %260 = vmatprep.subr.bf16.mxu1 %v1437_v6  ;;  %v1447_v13 = vld [vmem:[%s2079_s1 + $0x84] ss:$16 sps:$4 sm:$0xff]   ;;  %v1449_v14 = vld [vmem:[%s2079_s1 + $0x8c] ss:$16 sps:$4 sm:$0xff]   ;;  %v1451_v15 = vld [vmem:[%s2079_s1 + $0x80] ss:$16 sps:$4 sm:$0xff]  }
   0x6   :  { %v1452_v16 = vld [vmem:[%s2079_s1 + $0x88] ss:$16 sps:$4 sm:$0xff]   ;;  %v1453_v17 = vld [vmem:[%s2079_s1 + $0x64] ss:$16 sps:$4 sm:$0xff]   ;;  %v1455_v18 = vld [vmem:[%s2079_s1 + $0x6c] ss:$16 sps:$4 sm:$0xff]  }
   0x7   :  { %218 = vmatpush1.bf16.msra.mxu0 %v1439_v7  ;;  %v1457_v19 = vld [vmem:[%s2079_s1 + $0x60] ss:$16 sps:$4 sm:$0xff]   ;;  %v1458_v20 = vld [vmem:[%s2079_s1 + $0x68] ss:$16 sps:$4 sm:$0xff]   ;;  %v1459_v21 = vld [vmem:[%s2079_s1 + $0x44] ss:$16 sps:$4 sm:$0xff]  }
   0x8   :  { %261 = vmatpush1.bf16.msra.mxu1 %v1440_v8  ;;  %219 = vmatprep.subr.bf16.mxu0 %v1441_v9  ;;  %v1461_v22 = vld [vmem:[%s2079_s1 + $0x4c] ss:$16 sps:$4 sm:$0xff]   ;;  %v1463_v23 = vld [vmem:[%s2079_s1 + $0x40] ss:$16 sps:$4 sm:$0xff]   ;;  %v1464_v24 = vld [vmem:[%s2079_s1 + $0x48] ss:$16 sps:$4 sm:$0xff]  }
   0x9   :  { %262 = vmatprep.subr.bf16.mxu1 %v1443_v10  ;;  %v1465_v25 = vld [vmem:[%s2079_s1 + $0x24] ss:$16 sps:$4 sm:$0xff]   ;;  %v1467_v26 = vld [vmem:[%s2079_s1 + $0x2c] ss:$16 sps:$4 sm:$0xff]   ;;  %v1469_v27 = vld [vmem:[%s2079_s1 + $0x20] ss:$16 sps:$4 sm:$0xff]  }
   0xa   :  { %v1470_v28 = vld [vmem:[%s2079_s1 + $0x28] ss:$16 sps:$4 sm:$0xff]   ;;  %v1471_v29 = vld [vmem:[%s2079_s1 + $0x4] ss:$16 sps:$4 sm:$0xff]   ;;  %v1473_v30 = vld [vmem:[%s2079_s1 + $0xc] ss:$16 sps:$4 sm:$0xff]  }
   0xb   :  { %220 = vmatpush1.bf16.msra.mxu0 %v1445_v11  ;;  %v1475_v31 = vld [vmem:[%s2079_s1] ss:$16 sps:$4 sm:$0xff]   ;;  %v1476_v32 = vld [vmem:[%s2079_s1 + $0x8] ss:$16 sps:$4 sm:$0xff]   ;;  %v1480_v33 = vld [vmem:[%s2079_s1 + $0x1e4] ss:$16 sps:$4 sm:$0xff]  }
   0xc   :  { %263 = vmatpush1.bf16.msra.mxu1 %v1446_v12  ;;  %221 = vmatprep.subr.bf16.mxu0 %v1447_v13  ;;  %v1483_v34 = vld [vmem:[%s2079_s1 + $0x1ec] ss:$16 sps:$4 sm:$0xff]   ;;  %v1751_v35 = vld [vmem:[%s2080_s0] sm:$0xff]   ;;  %v1481_v37 = vld [vmem:[%s2079_s1 + $0x1e8] ss:$16 sps:$4 sm:$0xff]  }
   0xd   :  { %264 = vmatprep.subr.bf16.mxu1 %v1449_v14  ;;  %v1478_v36 = vld [vmem:[%s2079_s1 + $0x1e0] ss:$16 sps:$4 sm:$0xff]   ;;  %v1486_v38 = vld [vmem:[%s2079_s1 + $0x1c4] ss:$16 sps:$4 sm:$0xff]   ;;  %v1489_v39 = vld [vmem:[%s2079_s1 + $0x1cc] ss:$16 sps:$4 sm:$0xff]  }
   0xe   :  { %v1484_v40 = vld [vmem:[%s2079_s1 + $0x1c0] ss:$16 sps:$4 sm:$0xff]   ;;  %v1487_v41 = vld [vmem:[%s2079_s1 + $0x1c8] ss:$16 sps:$4 sm:$0xff]   ;;  %v1492_v42 = vld [vmem:[%s2079_s1 + $0x1a4] ss:$16 sps:$4 sm:$0xff]  }
   0xf   :  { %222 = vmatpush1.bf16.msra.mxu0 %v1451_v15  ;;  %v1495_v43 = vld [vmem:[%s2079_s1 + $0x1ac] ss:$16 sps:$4 sm:$0xff]   ;;  %v1490_v44 = vld [vmem:[%s2079_s1 + $0x1a0] ss:$16 sps:$4 sm:$0xff]   ;;  %v1493_v45 = vld [vmem:[%s2079_s1 + $0x1a8] ss:$16 sps:$4 sm:$0xff]  }
  0x10   :  { %265 = vmatpush1.bf16.msra.mxu1 %v1452_v16  ;;  %223 = vmatprep.subr.bf16.mxu0 %v1453_v17  ;;  %v1498_v46 = vld [vmem:[%s2079_s1 + $0x184] ss:$16 sps:$4 sm:$0xff]   ;;  %v1501_v47 = vld [vmem:[%s2079_s1 + $0x18c] ss:$16 sps:$4 sm:$0xff]   ;;  %v1496_v48 = vld [vmem:[%s2079_s1 + $0x180] ss:$16 sps:$4 sm:$0xff]  }
  0x11   :  { %266 = vmatprep.subr.bf16.mxu1 %v1455_v18  ;;  %v1499_v49 = vld [vmem:[%s2079_s1 + $0x188] ss:$16 sps:$4 sm:$0xff]   ;;  %v1504_v50 = vld [vmem:[%s2079_s1 + $0x164] ss:$16 sps:$4 sm:$0xff]   ;;  %v1507_v51 = vld [vmem:[%s2079_s1 + $0x16c] ss:$16 sps:$4 sm:$0xff]  }
  0x12   :  { %v1502_v52 = vld [vmem:[%s2079_s1 + $0x160] ss:$16 sps:$4 sm:$0xff]   ;;  %v1505_v53 = vld [vmem:[%s2079_s1 + $0x168] ss:$16 sps:$4 sm:$0xff]   ;;  %v1510_v54 = vld [vmem:[%s2079_s1 + $0x144] ss:$16 sps:$4 sm:$0xff]  }
  0x13   :  { %224 = vmatpush1.bf16.msra.mxu0 %v1457_v19  ;;  %v1513_v55 = vld [vmem:[%s2079_s1 + $0x14c] ss:$16 sps:$4 sm:$0xff]   ;;  %v1508_v56 = vld [vmem:[%s2079_s1 + $0x140] ss:$16 sps:$4 sm:$0xff]   ;;  %v1511_v57 = vld [vmem:[%s2079_s1 + $0x148] ss:$16 sps:$4 sm:$0xff]  }
  0x14   :  { %267 = vmatpush1.bf16.msra.mxu1 %v1458_v20  ;;  %225 = vmatprep.subr.bf16.mxu0 %v1459_v21  ;;  %v1516_v58 = vld [vmem:[%s2079_s1 + $0x124] ss:$16 sps:$4 sm:$0xff]   ;;  %v1519_v59 = vld [vmem:[%s2079_s1 + $0x12c] ss:$16 sps:$4 sm:$0xff]   ;;  %v1514_v60 = vld [vmem:[%s2079_s1 + $0x120] ss:$16 sps:$4 sm:$0xff]  }
  0x15   :  { %268 = vmatprep.subr.bf16.mxu1 %v1461_v22  ;;  %v1517_v61 = vld [vmem:[%s2079_s1 + $0x128] ss:$16 sps:$4 sm:$0xff]   ;;  %v1522_v62 = vld [vmem:[%s2079_s1 + $0x104] ss:$16 sps:$4 sm:$0xff]   ;;  %v1525_v63 = vld [vmem:[%s2079_s1 + $0x10c] ss:$16 sps:$4 sm:$0xff]  }
  0x16   :  { %v1520_v0 = vld [vmem:[%s2079_s1 + $0x100] ss:$16 sps:$4 sm:$0xff]   ;;  %v1523_v2 = vld [vmem:[%s2079_s1 + $0x108] ss:$16 sps:$4 sm:$0xff]   ;;  %v1528_v3 = vld [vmem:[%s2079_s1 + $0x2e4] ss:$16 sps:$4 sm:$0xff]  }
  0x17   :  { %226 = vmatpush1.bf16.msra.mxu0 %v1463_v23  ;;  %v1531_v4 = vld [vmem:[%s2079_s1 + $0x2ec] ss:$16 sps:$4 sm:$0xff]   ;;  %v1526_v5 = vld [vmem:[%s2079_s1 + $0x2e0] ss:$16 sps:$4 sm:$0xff]   ;;  %v1529_v6 = vld [vmem:[%s2079_s1 + $0x2e8] ss:$16 sps:$4 sm:$0xff]  }
  0x18   :  { %269 = vmatpush1.bf16.msra.mxu1 %v1464_v24  ;;  %227 = vmatprep.subr.bf16.mxu0 %v1465_v25  ;;  %v1534_v7 = vld [vmem:[%s2079_s1 + $0x2c4] ss:$16 sps:$4 sm:$0xff]   ;;  %v1537_v8 = vld [vmem:[%s2079_s1 + $0x2cc] ss:$16 sps:$4 sm:$0xff]   ;;  %v1532_v9 = vld [vmem:[%s2079_s1 + $0x2c0] ss:$16 sps:$4 sm:$0xff]  }
  0x19   :  { %270 = vmatprep.subr.bf16.mxu1 %v1467_v26  ;;  %v1535_v10 = vld [vmem:[%s2079_s1 + $0x2c8] ss:$16 sps:$4 sm:$0xff]   ;;  %v1540_v11 = vld [vmem:[%s2079_s1 + $0x2a4] ss:$16 sps:$4 sm:$0xff]   ;;  %v1543_v12 = vld [vmem:[%s2079_s1 + $0x2ac] ss:$16 sps:$4 sm:$0xff]  }
  0x1a   :  { %v1538_v13 = vld [vmem:[%s2079_s1 + $0x2a0] ss:$16 sps:$4 sm:$0xff]   ;;  %v1541_v14 = vld [vmem:[%s2079_s1 + $0x2a8] ss:$16 sps:$4 sm:$0xff]   ;;  %v1546_v15 = vld [vmem:[%s2079_s1 + $0x284] ss:$16 sps:$4 sm:$0xff]  }
  0x1b   :  { %228 = vmatpush1.bf16.msra.mxu0 %v1469_v27  ;;  %v1549_v16 = vld [vmem:[%s2079_s1 + $0x28c] ss:$16 sps:$4 sm:$0xff]   ;;  %v1544_v17 = vld [vmem:[%s2079_s1 + $0x280] ss:$16 sps:$4 sm:$0xff]   ;;  %v1547_v18 = vld [vmem:[%s2079_s1 + $0x288] ss:$16 sps:$4 sm:$0xff]  }
  0x1c   :  { %271 = vmatpush1.bf16.msra.mxu1 %v1470_v28  ;;  %229 = vmatprep.subr.bf16.mxu0 %v1471_v29  ;;  %v1552_v19 = vld [vmem:[%s2079_s1 + $0x264] ss:$16 sps:$4 sm:$0xff]   ;;  %v1555_v20 = vld [vmem:[%s2079_s1 + $0x26c] ss:$16 sps:$4 sm:$0xff]   ;;  %v1550_v21 = vld [vmem:[%s2079_s1 + $0x260] ss:$16 sps:$4 sm:$0xff]  }
  0x1d   :  { %272 = vmatprep.subr.bf16.mxu1 %v1473_v30  ;;  %v1553_v22 = vld [vmem:[%s2079_s1 + $0x268] ss:$16 sps:$4 sm:$0xff]   ;;  %v1558_v23 = vld [vmem:[%s2079_s1 + $0x244] ss:$16 sps:$4 sm:$0xff]   ;;  %v1561_v24 = vld [vmem:[%s2079_s1 + $0x24c] ss:$16 sps:$4 sm:$0xff]  }
  0x1e   :  { %v1556_v25 = vld [vmem:[%s2079_s1 + $0x240] ss:$16 sps:$4 sm:$0xff]   ;;  %v1559_v26 = vld [vmem:[%s2079_s1 + $0x248] ss:$16 sps:$4 sm:$0xff]   ;;  %v1564_v27 = vld [vmem:[%s2079_s1 + $0x224] ss:$16 sps:$4 sm:$0xff]  }
  0x1f   :  { %230 = vmatpush1.bf16.msra.mxu0 %v1475_v31  ;;  %v1567_v28 = vld [vmem:[%s2079_s1 + $0x22c] ss:$16 sps:$4 sm:$0xff]   ;;  %v1162_v29 = vld [vmem:[%s2081_s2] sm:$0xff]  ;;  %v1565_v31 = vld [vmem:[%s2079_s1 + $0x228] ss:$16 sps:$4 sm:$0xff]  }
  0x20   :  { %273 = vmatpush1.bf16.msra.mxu1 %v1476_v32  ;;  %494 = vmatprep.subr.bf16.mxu0 %v1480_v33  ;;  %v1562_v30 = vld [vmem:[%s2079_s1 + $0x220] ss:$16 sps:$4 sm:$0xff]   ;;  %v1163_v32 = vld [vmem:[%s2081_s2 + $0x8] sm:$0xff]  ;;  %v1570_v33 = vld [vmem:[%s2079_s1 + $0x204] ss:$16 sps:$4 sm:$0xff]  }
  0x21   :  { %537 = vmatprep.subr.bf16.mxu1 %v1483_v34  ;;  %1166 = vperm.xlu0 %1428, %v1162_v29   ;;  %v1573_v34 = vld [vmem:[%s2079_s1 + $0x20c] ss:$16 sps:$4 sm:$0xff]  }
  0x22   :  { %248 = vmatmul.mubr.bf16.vlgmr.msra.gmra.mxu0 %v1751_v35 }
  0x23   :  { %291 = vmatmul.mubr.bf16.vlgmr.msra.gmra.mxu1 %v1751_v35  ;;  %495 = vmatpush1.bf16.msra.mxu0 %v1478_v36  ;;  %v1568_v36 = vld [vmem:[%s2079_s1 + $0x200] ss:$16 sps:$4 sm:$0xff]  }
  0x24   :  { %538 = vmatpush1.bf16.msra.mxu1 %v1481_v37  ;;  %496 = vmatprep.subr.bf16.mxu0 %v1486_v38  ;;  %v1571_v37 = vld [vmem:[%s2079_s1 + $0x208] ss:$16 sps:$4 sm:$0xff]   ;;  %v1576_v38 = vld [vmem:[%s2079_s1 + $0x3e4] ss:$16 sps:$4 sm:$0xff]  }
  0x25   :  { %539 = vmatprep.subr.bf16.mxu1 %v1489_v39  ;;  %526 = vmatprep.mubr.bf16.mxu0 %v1622_v1  ;;  %v1579_v39 = vld [vmem:[%s2079_s1 + $0x3ec] ss:$16 sps:$4 sm:$0xff]  }
  0x26   :  { %569 = vmatprep.mubr.bf16.mxu1 %v1622_v1  ;;  %1171 = vperm.xlu0 %1428, %v1163_v32  }
  0x27   :  { %497 = vmatpush1.bf16.msra.mxu0 %v1484_v40  ;;  %v1574_v40 = vld [vmem:[%s2079_s1 + $0x3e0] ss:$16 sps:$4 sm:$0xff]  }
  0x28   :  { %540 = vmatpush1.bf16.msra.mxu1 %v1487_v41  ;;  %498 = vmatprep.subr.bf16.mxu0 %v1492_v42  ;;  %v1577_v41 = vld [vmem:[%s2079_s1 + $0x3e8] ss:$16 sps:$4 sm:$0xff]   ;;  %v1582_v42 = vld [vmem:[%s2079_s1 + $0x3c4] ss:$16 sps:$4 sm:$0xff]  }
  0x29   :  { %541 = vmatprep.subr.bf16.mxu1 %v1495_v43  ;;  %v1585_v43 = vld [vmem:[%s2079_s1 + $0x3cc] ss:$16 sps:$4 sm:$0xff]  }
  0x2b   :  { %499 = vmatpush1.bf16.msra.mxu0 %v1490_v44  ;;  %v1580_v44 = vld [vmem:[%s2079_s1 + $0x3c0] ss:$16 sps:$4 sm:$0xff]  }
  0x2c   :  { %542 = vmatpush1.bf16.msra.mxu1 %v1493_v45  ;;  %500 = vmatprep.subr.bf16.mxu0 %v1498_v46  ;;  %v1583_v45 = vld [vmem:[%s2079_s1 + $0x3c8] ss:$16 sps:$4 sm:$0xff]   ;;  %v1588_v46 = vld [vmem:[%s2079_s1 + $0x3a4] ss:$16 sps:$4 sm:$0xff]  }
  0x2d   :  { %543 = vmatprep.subr.bf16.mxu1 %v1501_v47  ;;  %v1591_v47 = vld [vmem:[%s2079_s1 + $0x3ac] ss:$16 sps:$4 sm:$0xff]  }
  0x2f   :  { %501 = vmatpush1.bf16.msra.mxu0 %v1496_v48  ;;  %v1586_v48 = vld [vmem:[%s2079_s1 + $0x3a0] ss:$16 sps:$4 sm:$0xff]  }
  0x30   :  { %544 = vmatpush1.bf16.msra.mxu1 %v1499_v49  ;;  %502 = vmatprep.subr.bf16.mxu0 %v1504_v50  ;;  %v1589_v49 = vld [vmem:[%s2079_s1 + $0x3a8] ss:$16 sps:$4 sm:$0xff]   ;;  %v1594_v50 = vld [vmem:[%s2079_s1 + $0x384] ss:$16 sps:$4 sm:$0xff]  }
  0x31   :  { %545 = vmatprep.subr.bf16.mxu1 %v1507_v51  ;;  %v1592_v51 = vld [vmem:[%s2079_s1 + $0x380] ss:$16 sps:$4 sm:$0xff]  }
  0x33   :  { %503 = vmatpush1.bf16.msra.mxu0 %v1502_v52  ;;  %v1595_v52 = vld [vmem:[%s2079_s1 + $0x388] ss:$16 sps:$4 sm:$0xff]  }
  0x34   :  { %546 = vmatpush1.bf16.msra.mxu1 %v1505_v53  ;;  %504 = vmatprep.subr.bf16.mxu0 %v1510_v54  ;;  %v1600_v53 = vld [vmem:[%s2079_s1 + $0x364] ss:$16 sps:$4 sm:$0xff]   ;;  %v1603_v54 = vld [vmem:[%s2079_s1 + $0x36c] ss:$16 sps:$4 sm:$0xff]  }
  0x35   :  { %547 = vmatprep.subr.bf16.mxu1 %v1513_v55  ;;  %v1598_v55 = vld [vmem:[%s2079_s1 + $0x360] ss:$16 sps:$4 sm:$0xff]  }
  0x37   :  { %505 = vmatpush1.bf16.msra.mxu0 %v1508_v56  ;;  %v1601_v56 = vld [vmem:[%s2079_s1 + $0x368] ss:$16 sps:$4 sm:$0xff]  }
  0x38   :  { %548 = vmatpush1.bf16.msra.mxu1 %v1511_v57  ;;  %506 = vmatprep.subr.bf16.mxu0 %v1516_v58  ;;  %v1606_v57 = vld [vmem:[%s2079_s1 + $0x344] ss:$16 sps:$4 sm:$0xff]   ;;  %v1609_v58 = vld [vmem:[%s2079_s1 + $0x34c] ss:$16 sps:$4 sm:$0xff]  }
  0x39   :  { %549 = vmatprep.subr.bf16.mxu1 %v1519_v59  ;;  %v1604_v59 = vld [vmem:[%s2079_s1 + $0x340] ss:$16 sps:$4 sm:$0xff]  }
  0x3b   :  { %507 = vmatpush1.bf16.msra.mxu0 %v1514_v60  ;;  %v1607_v60 = vld [vmem:[%s2079_s1 + $0x348] ss:$16 sps:$4 sm:$0xff]  }
  0x3c   :  { %550 = vmatpush1.bf16.msra.mxu1 %v1517_v61  ;;  %508 = vmatprep.subr.bf16.mxu0 %v1522_v62  ;;  %v1612_v61 = vld [vmem:[%s2079_s1 + $0x324] ss:$16 sps:$4 sm:$0xff]   ;;  %v1615_v62 = vld [vmem:[%s2079_s1 + $0x32c] ss:$16 sps:$4 sm:$0xff]  }
  0x3d   :  { %551 = vmatprep.subr.bf16.mxu1 %v1525_v63  ;;  %v1610_v63 = vld [vmem:[%s2079_s1 + $0x320] ss:$16 sps:$4 sm:$0xff]  }
  0x3f   :  { %509 = vmatpush1.bf16.msra.mxu0 %v1520_v0  ;;  %v1613_v0 = vld [vmem:[%s2079_s1 + $0x328] ss:$16 sps:$4 sm:$0xff]  }
  0x40   :  { %552 = vmatpush1.bf16.msra.mxu1 %v1523_v2  ;;  %781 = vmatprep.subr.bf16.mxu0 %v1528_v3  ;;  %v1618_v2 = vld [vmem:[%s2079_s1 + $0x304] ss:$16 sps:$4 sm:$0xff]   ;;  %v1621_v3 = vld [vmem:[%s2079_s1 + $0x30c] ss:$16 sps:$4 sm:$0xff]  }
  0x41   :  { %824 = vmatprep.subr.bf16.mxu1 %v1531_v4  ;;  %v1616_v4 = vld [vmem:[%s2079_s1 + $0x300] ss:$16 sps:$4 sm:$0xff]  }
  0x42   :  { %527 = vmatmul.mubr.bf16.vlgmr.msra.gmra.mxu0 %v1751_v35 }
  0x43   :  { %570 = vmatmul.mubr.bf16.vlgmr.msra.gmra.mxu1 %v1751_v35  ;;  %782 = vmatpush1.bf16.msra.mxu0 %v1526_v5  ;;  %v1619_v5 = vld [vmem:[%s2079_s1 + $0x308] ss:$16 sps:$4 sm:$0xff]  }
  0x44   :  { %825 = vmatpush1.bf16.msra.mxu1 %v1529_v6  ;;  %783 = vmatprep.subr.bf16.mxu0 %v1534_v7 }
  0x45   :  { %826 = vmatprep.subr.bf16.mxu1 %v1537_v8  ;;  %813 = vmatprep.mubr.bf16.mxu0 %v1622_v1 }
  0x46   :  { %856 = vmatprep.mubr.bf16.mxu1 %v1622_v1 }
  0x47   :  { %784 = vmatpush1.bf16.msra.mxu0 %v1532_v9 }
  0x48   :  { %827 = vmatpush1.bf16.msra.mxu1 %v1535_v10  ;;  %785 = vmatprep.subr.bf16.mxu0 %v1540_v11 }
  0x49   :  { %828 = vmatprep.subr.bf16.mxu1 %v1543_v12 }
  0x4b   :  { %786 = vmatpush1.bf16.msra.mxu0 %v1538_v13 }
  0x4c   :  { %829 = vmatpush1.bf16.msra.mxu1 %v1541_v14  ;;  %787 = vmatprep.subr.bf16.mxu0 %v1546_v15 }
  0x4d   :  { %830 = vmatprep.subr.bf16.mxu1 %v1549_v16 }
  0x4f   :  { %788 = vmatpush1.bf16.msra.mxu0 %v1544_v17 }
  0x50   :  { %831 = vmatpush1.bf16.msra.mxu1 %v1547_v18  ;;  %789 = vmatprep.subr.bf16.mxu0 %v1552_v19 }
  0x51   :  { %832 = vmatprep.subr.bf16.mxu1 %v1555_v20 }
  0x53   :  { %790 = vmatpush1.bf16.msra.mxu0 %v1550_v21 }
  0x54   :  { %833 = vmatpush1.bf16.msra.mxu1 %v1553_v22  ;;  %791 = vmatprep.subr.bf16.mxu0 %v1558_v23 }
  0x55   :  { %834 = vmatprep.subr.bf16.mxu1 %v1561_v24 }
  0x57   :  { %792 = vmatpush1.bf16.msra.mxu0 %v1556_v25 }
  0x58   :  { %835 = vmatpush1.bf16.msra.mxu1 %v1559_v26  ;;  %793 = vmatprep.subr.bf16.mxu0 %v1564_v27 }
  0x59   :  { %836 = vmatprep.subr.bf16.mxu1 %v1567_v28 }
  0x5b   :  { %794 = vmatpush1.bf16.msra.mxu0 %v1562_v30 }
  0x5c   :  { %837 = vmatpush1.bf16.msra.mxu1 %v1565_v31  ;;  %795 = vmatprep.subr.bf16.mxu0 %v1570_v33 }
  0x5d   :  { %838 = vmatprep.subr.bf16.mxu1 %v1573_v34 }
  0x5f   :  { %796 = vmatpush1.bf16.msra.mxu0 %v1568_v36 }
  0x60   :  { %839 = vmatpush1.bf16.msra.mxu1 %v1571_v37  ;;  %1068 = vmatprep.subr.bf16.mxu0 %v1576_v38 }
  0x61   :  { %1111 = vmatprep.subr.bf16.mxu1 %v1579_v39 }
  0x62   :  { %814 = vmatmul.mubr.bf16.vlgmr.msra.gmra.mxu0 %v1751_v35 }
  0x63   :  { %857 = vmatmul.mubr.bf16.vlgmr.msra.gmra.mxu1 %v1751_v35  ;;  %1069 = vmatpush1.bf16.msra.mxu0 %v1574_v40 }
  0x64   :  { %1112 = vmatpush1.bf16.msra.mxu1 %v1577_v41  ;;  %1070 = vmatprep.subr.bf16.mxu0 %v1582_v42 }
  0x65   :  { %1113 = vmatprep.subr.bf16.mxu1 %v1585_v43  ;;  %1100 = vmatprep.mubr.bf16.mxu0 %v1622_v1 }
  0x66   :  { %1143 = vmatprep.mubr.bf16.mxu1 %v1622_v1  ;;  %v1597_v1 = vld [vmem:[%s2079_s1 + $0x38c] ss:$16 sps:$4 sm:$0xff]  }
  0x67   :  { %1071 = vmatpush1.bf16.msra.mxu0 %v1580_v44 }
  0x68   :  { %1114 = vmatpush1.bf16.msra.mxu1 %v1583_v45  ;;  %1072 = vmatprep.subr.bf16.mxu0 %v1588_v46 }
  0x69   :  { %1115 = vmatprep.subr.bf16.mxu1 %v1591_v47 }
  0x6b   :  { %1073 = vmatpush1.bf16.msra.mxu0 %v1586_v48 }
  0x6c   :  { %1116 = vmatpush1.bf16.msra.mxu1 %v1589_v49  ;;  %1074 = vmatprep.subr.bf16.mxu0 %v1594_v50 }
  0x6d   :  { %1117 = vmatprep.subr.bf16.mxu1 %v1597_v1 }
  0x6f   :  { %1075 = vmatpush1.bf16.msra.mxu0 %v1592_v51 }
  0x70   :  { %1118 = vmatpush1.bf16.msra.mxu1 %v1595_v52  ;;  %1076 = vmatprep.subr.bf16.mxu0 %v1600_v53 }
  0x71   :  { %1119 = vmatprep.subr.bf16.mxu1 %v1603_v54 }
  0x73   :  { %1077 = vmatpush1.bf16.msra.mxu0 %v1598_v55 }
  0x74   :  { %1120 = vmatpush1.bf16.msra.mxu1 %v1601_v56  ;;  %1078 = vmatprep.subr.bf16.mxu0 %v1606_v57 }
  0x75   :  { %1121 = vmatprep.subr.bf16.mxu1 %v1609_v58 }
  0x77   :  { %1079 = vmatpush1.bf16.msra.mxu0 %v1604_v59 }
  0x78   :  { %1122 = vmatpush1.bf16.msra.mxu1 %v1607_v60  ;;  %1080 = vmatprep.subr.bf16.mxu0 %v1612_v61 }
  0x79   :  { %1123 = vmatprep.subr.bf16.mxu1 %v1615_v62 }
  0x7b   :  { %1081 = vmatpush1.bf16.msra.mxu0 %v1610_v63 }
  0x7c   :  { %1124 = vmatpush1.bf16.msra.mxu1 %v1613_v0  ;;  %1082 = vmatprep.subr.bf16.mxu0 %v1618_v2 }
  0x7d   :  { %1125 = vmatprep.subr.bf16.mxu1 %v1621_v3 }
  0x7f   :  { %1083 = vmatpush1.bf16.msra.mxu0 %v1616_v4 }
  0x80   :  { %1126 = vmatpush1.bf16.msra.mxu1 %v1619_v5 }
  0x82   :  { %1101 = vmatmul.mubr.bf16.vlgmr.msra.gmra.mxu0 %v1751_v35 }
  0x83   :  { %1144 = vmatmul.mubr.bf16.vlgmr.msra.gmra.mxu1 %v1751_v35 }
  0x9c   :  { %v1167_v40 = vpop.permute.xlu0 %1166 }
  0xa1   :  { %v1172_v5 = vpop.permute.xlu0 %1171 }
  0xe2   :  { %v249_v6 = vpop.f32.mrf.mxu0 }
  0xe3   :  { %v292_v7 = vpop.f32.mrf.mxu1 }
  0xe4   :  { %v251_v8 = vpop.f32.mrf.mxu0 }
  0xe5   :  { %v294_v9 = vpop.f32.mrf.mxu1 }
  0xe6   :  { %v253_v10 = vpop.f32.mrf.mxu0 }
  0xe7   :  { %v296_v11 = vpop.f32.mrf.mxu1 }
  0xe8   :  { %v255_v12 = vpop.f32.mrf.mxu0 }
  0xe9   :  { %v298_v13 = vpop.f32.mrf.mxu1 }
 0x102   :  { %v528_v14 = vpop.f32.mrf.mxu0 }
 0x103   :  { %v571_v15 = vpop.f32.mrf.mxu1  ;;  %v580_v27 = vmax.f32 %v249_v6, %v528_v14 }
 0x104   :  { %v530_v16 = vpop.f32.mrf.mxu0  ;;  %v582_v28 = vmax.f32 %v292_v7, %v571_v15 }
 0x105   :  { %v573_v17 = vpop.f32.mrf.mxu1  ;;  %v581_v31 = vmax.f32 %v251_v8, %v530_v16 }
 0x106   :  { %v532_v18 = vpop.f32.mrf.mxu0  ;;  %v583_v32 = vmax.f32 %v294_v9, %v573_v17 }
 0x107   :  { %v575_v19 = vpop.f32.mrf.mxu1  ;;  %v584_v43 = vmax.f32 %v253_v10, %v532_v18 }
 0x108   :  { %v534_v20 = vpop.f32.mrf.mxu0  ;;  %v586_v44 = vmax.f32 %v296_v11, %v575_v19 }
 0x109   :  { %v577_v21 = vpop.f32.mrf.mxu1  ;;  %v585_v45 = vmax.f32 %v255_v12, %v534_v20 }
 0x10a   :  { %v587_v46 = vmax.f32 %v298_v13, %v577_v21 }
 0x122   :  { %v815_v22 = vpop.f32.mrf.mxu0 }
 0x123   :  { %v858_v23 = vpop.f32.mrf.mxu1  ;;  %v867_v33 = vmax.f32 %v580_v27, %v815_v22 }
 0x124   :  { %v817_v24 = vpop.f32.mrf.mxu0  ;;  %v869_v34 = vmax.f32 %v582_v28, %v858_v23 }
 0x125   :  { %v860_v35 = vpop.f32.mrf.mxu1  ;;  %v868_v38 = vmax.f32 %v581_v31, %v817_v24 }
 0x126   :  { %v819_v25 = vpop.f32.mrf.mxu0  ;;  %v870_v39 = vmax.f32 %v583_v32, %v860_v35 }
 0x127   :  { %v862_v26 = vpop.f32.mrf.mxu1  ;;  %v871_v52 = vmax.f32 %v584_v43, %v819_v25 }
 0x128   :  { %v821_v29 = vpop.f32.mrf.mxu0  ;;  %v873_v53 = vmax.f32 %v586_v44, %v862_v26 }
 0x129   :  { %v864_v30 = vpop.f32.mrf.mxu1  ;;  %v872_v54 = vmax.f32 %v585_v45, %v821_v29 }
 0x12a   :  { %v874_v55 = vmax.f32 %v587_v46, %v864_v30 }
 0x142   :  { %v1102_v36 = vpop.f32.mrf.mxu0 }
 0x143   :  { %v1145_v37 = vpop.f32.mrf.mxu1  ;;  %v1154_v41 = vmax.f32 %v867_v33, %v1102_v36 }
 0x144   :  { %v1156_v42 = vmax.f32 %v869_v34, %v1145_v37  ;;  %v1104_v47 = vpop.f32.mrf.mxu0 }
 0x145   :  { %v1147_v48 = vpop.f32.mrf.mxu1  ;;  %v1174_v49 = vadd.f32 %v1167_v40, %v1154_v41  ;;  %v1155_v1 = vmax.f32 %v868_v38, %v1104_v47 }
 0x146   :  { %v1176_v50 = vadd.f32 %v1167_v40, %v1156_v42  ;;  %v1157_v51 = vmax.f32 %v870_v39, %v1147_v48  ;;  %v1106_v56 = vpop.f32.mrf.mxu0 }
 0x147   :  { %v1149_v57 = vpop.f32.mrf.mxu1  ;;  %v1182_v58 = vmax.f32 %v1174_v49, 0.0  ;;  %v1175_v60 = vadd.f32 %v1167_v40, %v1155_v1  ;;  %v1158_v62 = vmax.f32 %v871_v52, %v1106_v56 }
 0x148   :  { %v1184_v59 = vmax.f32 %v1176_v50, 0.0  ;;  %v1177_v61 = vadd.f32 %v1167_v40, %v1157_v51  ;;  %v1160_v63 = vmax.f32 %v873_v53, %v1149_v57  ;;  %v1108_v0 = vpop.f32.mrf.mxu0 }
 0x149   :  { %v1151_v2 = vpop.f32.mrf.mxu1  ;;  %1190 = vst [vmem:[%s2082_s3] sm:$0xff] %v1182_v58  ;;  %v1183_v3 = vmax.f32 %v1175_v60, 0.0  ;;  %v1159_v6 = vmax.f32 %v872_v54, %v1108_v0  ;;  %v1178_v8 = vadd.f32 %v1172_v5, %v1158_v62 }
 0x14a   :  { %1192 = vst [vmem:[%s2082_s3 + $0x10] sm:$0xff] %v1184_v59  ;;  %v1185_v4 = vmax.f32 %v1177_v61, 0.0  ;;  %v1161_v7 = vmax.f32 %v874_v55, %v1151_v2  ;;  %v1180_v9 = vadd.f32 %v1172_v5, %v1160_v63 }
 0x14b   :  { %1191 = vst [vmem:[%s2082_s3 + $0x8] sm:$0xff] %v1183_v3  ;;  %v1179_v10 = vadd.f32 %v1172_v5, %v1159_v6  ;;  %v1186_v12 = vmax.f32 %v1178_v8, 0.0 }
 0x14c   :  { %1193 = vst [vmem:[%s2082_s3 + $0x18] sm:$0xff] %v1185_v4  ;;  %v1181_v11 = vadd.f32 %v1172_v5, %v1161_v7  ;;  %v1188_v13 = vmax.f32 %v1180_v9, 0.0 }
 0x14d   :  { %v1187_v14 = vmax.f32 %v1179_v10, 0.0  ;;  %1194 = vst [vmem:[%s2082_s3 + $0x20] sm:$0xff] %v1186_v12 }
 0x14e   :  { %v1189_v15 = vmax.f32 %v1181_v11, 0.0  ;;  %1196 = vst [vmem:[%s2082_s3 + $0x30] sm:$0xff] %v1188_v13 }
 0x14f   :  { %1195 = vst [vmem:[%s2082_s3 + $0x28] sm:$0xff] %v1187_v14 }
 0x150   :  { %1197 = vst [vmem:[%s2082_s3 + $0x38] sm:$0xff] %v1189_v15 }

// kernel: foodnet_forward.4
= control target key start
LH: loop header
LB: loop body
LE: loop exit
PB: predicated region body
PF: predicated region fallthrough
CT: control target
= control target key end

     0   :  { %v1053_v1 = vmov 0   ;;  %s1290_s1 = inlined_call_operand.vmem [shape: bf16[4,256,128], index: 1, kind: input, shape index: {}]   ;;  %s1291_s0 = inlined_call_operand.vmem [shape: bf16[16,256], index: 0, kind: input, shape index: {}]   ;;  %s1292_s2 = inlined_call_operand.vmem [shape: f32[16,1], index: 2, kind: input, shape index: {}]   ;;  %s1293_s3 = inlined_call_operand.vmem [shape: f32[16,128], index: 3, kind: output, shape index: {}]  }
   0x1   :  { %v986_v0 = vld [vmem:[%s1290_s1 + $0x78] sm:$0xff]   ;;  %985 = vset.pattern.permute.xlu0 %v1053_v1  ;;  %v990_v5 = vld [vmem:[%s1290_s1 + $0x70] sm:$0xff]   ;;  %v994_v9 = vld [vmem:[%s1290_s1 + $0x68] sm:$0xff]  }
   0x2   :  { %v987_v2 = vld [vmem:[%s1290_s1 + $0xf8] sm:$0xff]   ;;  %896 = vmatprep.subr.bf16.mxu0 %v986_v0  ;;  %v991_v6 = vld [vmem:[%s1290_s1 + $0xf0] sm:$0xff]   ;;  %v995_v10 = vld [vmem:[%s1290_s1 + $0xe8] sm:$0xff]  }
   0x3   :  { %v988_v3 = vld [vmem:[%s1290_s1 + $0x38] sm:$0xff]   ;;  %918 = vmatprep.subr.bf16.mxu1 %v987_v2  ;;  %v992_v7 = vld [vmem:[%s1290_s1 + $0x30] sm:$0xff]   ;;  %v996_v11 = vld [vmem:[%s1290_s1 + $0x28] sm:$0xff]  }
   0x4   :  { %v989_v4 = vld [vmem:[%s1290_s1 + $0xb8] sm:$0xff]   ;;  %897 = vmatpush3.bf16.msra.mxu0 %v988_v3  ;;  %v993_v8 = vld [vmem:[%s1290_s1 + $0xb0] sm:$0xff]   ;;  %v997_v12 = vld [vmem:[%s1290_s1 + $0xa8] sm:$0xff]  }
   0x5   :  { %919 = vmatpush3.bf16.msra.mxu1 %v989_v4  ;;  %898 = vmatprep.subr.bf16.mxu0 %v990_v5  ;;  %v998_v13 = vld [vmem:[%s1290_s1 + $0x60] sm:$0xff]   ;;  %v1002_v17 = vld [vmem:[%s1290_s1 + $0x58] sm:$0xff]   ;;  %v1006_v21 = vld [vmem:[%s1290_s1 + $0x50] sm:$0xff]  }
   0x6   :  { %920 = vmatprep.subr.bf16.mxu1 %v991_v6  ;;  %v999_v14 = vld [vmem:[%s1290_s1 + $0xe0] sm:$0xff]   ;;  %v1003_v18 = vld [vmem:[%s1290_s1 + $0xd8] sm:$0xff]   ;;  %v1007_v22 = vld [vmem:[%s1290_s1 + $0xd0] sm:$0xff]  }
   0x7   :  { %v1000_v15 = vld [vmem:[%s1290_s1 + $0x20] sm:$0xff]   ;;  %v1004_v19 = vld [vmem:[%s1290_s1 + $0x18] sm:$0xff]   ;;  %v1008_v23 = vld [vmem:[%s1290_s1 + $0x10] sm:$0xff]  }
   0x8   :  { %899 = vmatpush3.bf16.msra.mxu0 %v992_v7  ;;  %v1001_v16 = vld [vmem:[%s1290_s1 + $0xa0] sm:$0xff]   ;;  %v1005_v20 = vld [vmem:[%s1290_s1 + $0x98] sm:$0xff]   ;;  %v1009_v24 = vld [vmem:[%s1290_s1 + $0x90] sm:$0xff]  }
   0x9   :  { %921 = vmatpush3.bf16.msra.mxu1 %v993_v8  ;;  %900 = vmatprep.subr.bf16.mxu0 %v994_v9  ;;  %v1010_v25 = vld [vmem:[%s1290_s1 + $0x48] sm:$0xff]   ;;  %v1014_v29 = vld [vmem:[%s1290_s1 + $0x40] sm:$0xff]   ;;  %v1021_v35 = vld [vmem:[%s1290_s1 + $0x178] sm:$0xff]  }
   0xa   :  { %922 = vmatprep.subr.bf16.mxu1 %v995_v10  ;;  %v1011_v26 = vld [vmem:[%s1290_s1 + $0xc8] sm:$0xff]   ;;  %v1015_v30 = vld [vmem:[%s1290_s1 + $0xc0] sm:$0xff]   ;;  %v1022_v36 = vld [vmem:[%s1290_s1 + $0x1f8] sm:$0xff]  }
   0xb   :  { %v1012_v27 = vld [vmem:[%s1290_s1 + $0x8] sm:$0xff]   ;;  %v1016_v31 = vld [vmem:[%s1290_s1] sm:$0xff]   ;;  %v1023_v37 = vld [vmem:[%s1290_s1 + $0x138] sm:$0xff]  }
   0xc   :  { %901 = vmatpush3.bf16.msra.mxu0 %v996_v11  ;;  %v1013_v28 = vld [vmem:[%s1290_s1 + $0x88] sm:$0xff]   ;;  %v1017_v32 = vld [vmem:[%s1290_s1 + $0x80] sm:$0xff]   ;;  %v1024_v38 = vld [vmem:[%s1290_s1 + $0x1b8] sm:$0xff]  }
   0xd   :  { %923 = vmatpush3.bf16.msra.mxu1 %v997_v12  ;;  %902 = vmatprep.subr.bf16.mxu0 %v998_v13  ;;  %v1018_v33 = vld [vmem:[%s1291_s0 + $0x4] ss:$8 sps:$4 sm:$0xff]   ;;  %v1176_v34 = vld [vmem:[%s1291_s0] ss:$8 sps:$4 sm:$0xff]   ;;  %v1025_v39 = vld [vmem:[%s1290_s1 + $0x170] sm:$0xff]  }
   0xe   :  { %924 = vmatprep.subr.bf16.mxu1 %v999_v14  ;;  %187 = vmatprep.mubr.bf16.mxu0 %v1018_v33  ;;  %v1026_v40 = vld [vmem:[%s1290_s1 + $0x1f0] sm:$0xff]   ;;  %v1029_v43 = vld [vmem:[%s1290_s1 + $0x168] sm:$0xff]   ;;  %v1033_v47 = vld [vmem:[%s1290_s1 + $0x160] sm:$0xff]  }
   0xf   :  { %357 = vmatprep.mubr.bf16.mxu1 %v1018_v33  ;;  %v1027_v41 = vld [vmem:[%s1290_s1 + $0x130] sm:$0xff]   ;;  %v1030_v44 = vld [vmem:[%s1290_s1 + $0x1e8] sm:$0xff]   ;;  %v1034_v48 = vld [vmem:[%s1290_s1 + $0x1e0] sm:$0xff]  }
  0x10   :  { %903 = vmatpush3.bf16.msra.mxu0 %v1000_v15  ;;  %v1028_v42 = vld [vmem:[%s1290_s1 + $0x1b0] sm:$0xff]   ;;  %v1031_v45 = vld [vmem:[%s1290_s1 + $0x128] sm:$0xff]   ;;  %v1035_v49 = vld [vmem:[%s1290_s1 + $0x120] sm:$0xff]  }
  0x11   :  { %925 = vmatpush3.bf16.msra.mxu1 %v1001_v16  ;;  %904 = vmatprep.subr.bf16.mxu0 %v1002_v17  ;;  %v1032_v46 = vld [vmem:[%s1290_s1 + $0x1a8] sm:$0xff]   ;;  %v1036_v50 = vld [vmem:[%s1290_s1 + $0x1a0] sm:$0xff]   ;;  %v1037_v51 = vld [vmem:[%s1290_s1 + $0x158] sm:$0xff]  }
  0x12   :  { %926 = vmatprep.subr.bf16.mxu1 %v1003_v18  ;;  %v1038_v52 = vld [vmem:[%s1290_s1 + $0x1d8] sm:$0xff]   ;;  %v1041_v55 = vld [vmem:[%s1290_s1 + $0x150] sm:$0xff]   ;;  %v1045_v59 = vld [vmem:[%s1290_s1 + $0x148] sm:$0xff]  }
  0x13   :  { %v1039_v53 = vld [vmem:[%s1290_s1 + $0x118] sm:$0xff]   ;;  %v1042_v56 = vld [vmem:[%s1290_s1 + $0x1d0] sm:$0xff]   ;;  %v1046_v60 = vld [vmem:[%s1290_s1 + $0x1c8] sm:$0xff]  }
  0x14   :  { %905 = vmatpush3.bf16.msra.mxu0 %v1004_v19  ;;  %v1040_v54 = vld [vmem:[%s1290_s1 + $0x198] sm:$0xff]   ;;  %v1043_v57 = vld [vmem:[%s1290_s1 + $0x110] sm:$0xff]   ;;  %v1047_v61 = vld [vmem:[%s1290_s1 + $0x108] sm:$0xff]  }
  0x15   :  { %927 = vmatpush3.bf16.msra.mxu1 %v1005_v20  ;;  %906 = vmatprep.subr.bf16.mxu0 %v1006_v21  ;;  %v1044_v58 = vld [vmem:[%s1290_s1 + $0x190] sm:$0xff]   ;;  %v1048_v62 = vld [vmem:[%s1290_s1 + $0x188] sm:$0xff]   ;;  %v1049_v63 = vld [vmem:[%s1290_s1 + $0x140] sm:$0xff]  }
  0x16   :  { %928 = vmatprep.subr.bf16.mxu1 %v1007_v22  ;;  %v1050_v0 = vld [vmem:[%s1290_s1 + $0x1c0] sm:$0xff]   ;;  %v713_v4 = vld [vmem:[%s1292_s2 + $0x8] sm:$0xff] }
  0x17   :  { %v1051_v1 = vld [vmem:[%s1290_s1 + $0x100] sm:$0xff]  }
  0x18   :  { %907 = vmatpush3.bf16.msra.mxu0 %v1008_v23  ;;  %v1052_v2 = vld [vmem:[%s1290_s1 + $0x180] sm:$0xff]  }
  0x19   :  { %929 = vmatpush3.bf16.msra.mxu1 %v1009_v24  ;;  %908 = vmatprep.subr.bf16.mxu0 %v1010_v25  ;;  %v712_v3 = vld [vmem:[%s1292_s2] sm:$0xff] }
  0x1a   :  { %930 = vmatprep.subr.bf16.mxu1 %v1011_v26  ;;  %716 = vperm.xlu0 %985, %v712_v3  }
  0x1c   :  { %909 = vmatpush3.bf16.msra.mxu0 %v1012_v27 }
  0x1d   :  { %931 = vmatpush3.bf16.msra.mxu1 %v1013_v28  ;;  %910 = vmatprep.subr.bf16.mxu0 %v1014_v29 }
  0x1e   :  { %932 = vmatprep.subr.bf16.mxu1 %v1015_v30  ;;  %721 = vperm.xlu0 %985, %v713_v4  }
  0x20   :  { %911 = vmatpush3.bf16.msra.mxu0 %v1016_v31 }
  0x21   :  { %933 = vmatpush3.bf16.msra.mxu1 %v1017_v32  ;;  %940 = vmatprep.subr.bf16.mxu0 %v1021_v35 }
  0x22   :  { %962 = vmatprep.subr.bf16.mxu1 %v1022_v36 }
  0x23   :  { %188 = vmatmul.mubr.bf16.vlgmr.msra.gmra.mxu0 %v1176_v34 }
  0x24   :  { %358 = vmatmul.mubr.bf16.vlgmr.msra.gmra.mxu1 %v1176_v34  ;;  %529 = vmatprep.mubr.bf16.mxu0 %v1018_v33 }
  0x25   :  { %941 = vmatpush3.bf16.msra.mxu0 %v1023_v37  ;;  %701 = vmatprep.mubr.bf16.mxu1 %v1018_v33 }
  0x26   :  { %963 = vmatpush3.bf16.msra.mxu1 %v1024_v38  ;;  %942 = vmatprep.subr.bf16.mxu0 %v1025_v39 }
  0x27   :  { %964 = vmatprep.subr.bf16.mxu1 %v1026_v40 }
  0x29   :  { %943 = vmatpush3.bf16.msra.mxu0 %v1027_v41 }
  0x2a   :  { %965 = vmatpush3.bf16.msra.mxu1 %v1028_v42  ;;  %944 = vmatprep.subr.bf16.mxu0 %v1029_v43 }
  0x2b   :  { %966 = vmatprep.subr.bf16.mxu1 %v1030_v44 }
  0x2d   :  { %945 = vmatpush3.bf16.msra.mxu0 %v1031_v45 }
  0x2e   :  { %967 = vmatpush3.bf16.msra.mxu1 %v1032_v46  ;;  %946 = vmatprep.subr.bf16.mxu0 %v1033_v47 }
  0x2f   :  { %968 = vmatprep.subr.bf16.mxu1 %v1034_v48 }
  0x31   :  { %947 = vmatpush3.bf16.msra.mxu0 %v1035_v49 }
  0x32   :  { %969 = vmatpush3.bf16.msra.mxu1 %v1036_v50  ;;  %948 = vmatprep.subr.bf16.mxu0 %v1037_v51 }
  0x33   :  { %970 = vmatprep.subr.bf16.mxu1 %v1038_v52 }
  0x35   :  { %949 = vmatpush3.bf16.msra.mxu0 %v1039_v53 }
  0x36   :  { %971 = vmatpush3.bf16.msra.mxu1 %v1040_v54  ;;  %950 = vmatprep.subr.bf16.mxu0 %v1041_v55 }
  0x37   :  { %972 = vmatprep.subr.bf16.mxu1 %v1042_v56 }
  0x39   :  { %951 = vmatpush3.bf16.msra.mxu0 %v1043_v57 }
  0x3a   :  { %973 = vmatpush3.bf16.msra.mxu1 %v1044_v58  ;;  %952 = vmatprep.subr.bf16.mxu0 %v1045_v59 }
  0x3b   :  { %974 = vmatprep.subr.bf16.mxu1 %v1046_v60 }
  0x3d   :  { %953 = vmatpush3.bf16.msra.mxu0 %v1047_v61 }
  0x3e   :  { %975 = vmatpush3.bf16.msra.mxu1 %v1048_v62  ;;  %954 = vmatprep.subr.bf16.mxu0 %v1049_v63 }
  0x3f   :  { %976 = vmatprep.subr.bf16.mxu1 %v1050_v0 }
  0x41   :  { %955 = vmatpush3.bf16.msra.mxu0 %v1051_v1 }
  0x42   :  { %977 = vmatpush3.bf16.msra.mxu1 %v1052_v2 }
  0x44   :  { %530 = vmatmul.mubr.bf16.vlgmr.msra.gmra.mxu0 %v1176_v34 }
  0x45   :  { %702 = vmatmul.mubr.bf16.vlgmr.msra.gmra.mxu1 %v1176_v34 }
  0x95   :  { %v717_v27 = vpop.permute.xlu0 %716 }
  0x99   :  { %v722_v38 = vpop.permute.xlu0 %721 }
  0xe3   :  { %v912_v5 = vpop.f32.mrf.mxu0 }
  0xe4   :  { %v934_v6 = vpop.f32.mrf.mxu1 }
  0xe5   :  { %v913_v7 = vpop.f32.mrf.mxu0 }
  0xe6   :  { %v935_v8 = vpop.f32.mrf.mxu1  ;;  %v914_v12 = vadd.f32 %v913_v7, %v912_v5 }
  0xe7   :  { %v915_v9 = vpop.f32.mrf.mxu0  ;;  %v936_v13 = vadd.f32 %v935_v8, %v934_v6 }
  0xe8   :  { %v937_v10 = vpop.f32.mrf.mxu1 }
  0xe9   :  { %v916_v11 = vpop.f32.mrf.mxu0  ;;  %v366_v18 = vmax.f32 %v914_v12, %v936_v13 }
  0xea   :  { %v938_v14 = vpop.f32.mrf.mxu1  ;;  %v917_v19 = vadd.f32 %v916_v11, %v915_v9 }
  0xeb   :  { %v939_v20 = vadd.f32 %v938_v14, %v937_v10 }
  0xed   :  { %v367_v29 = vmax.f32 %v917_v19, %v939_v20 }
 0x104   :  { %v956_v15 = vpop.f32.mrf.mxu0 }
 0x105   :  { %v978_v16 = vpop.f32.mrf.mxu1 }
 0x106   :  { %v957_v17 = vpop.f32.mrf.mxu0 }
 0x107   :  { %v958_v21 = vadd.f32 %v957_v17, %v956_v15  ;;  %v979_v22 = vpop.f32.mrf.mxu1 }
 0x108   :  { %v959_v23 = vpop.f32.mrf.mxu0  ;;  %v980_v25 = vadd.f32 %v979_v22, %v978_v16 }
 0x109   :  { %v538_v24 = vmax.f32 %v366_v18, %v958_v21  ;;  %v981_v26 = vpop.f32.mrf.mxu1 }
 0x10a   :  { %v960_v28 = vpop.f32.mrf.mxu0 }
 0x10b   :  { %v710_v30 = vmax.f32 %v538_v24, %v980_v25  ;;  %v961_v31 = vadd.f32 %v960_v28, %v959_v23  ;;  %v982_v32 = vpop.f32.mrf.mxu1 }
 0x10c   :  { %v983_v35 = vadd.f32 %v982_v32, %v981_v26 }
 0x10d   :  { %v724_v33 = vadd.f32 %v717_v27, %v710_v30  ;;  %v539_v34 = vmax.f32 %v367_v29, %v961_v31 }
 0x10f   :  { %v726_v36 = vmax.f32 %v724_v33, 0.0  ;;  %v711_v37 = vmax.f32 %v539_v34, %v983_v35 }
 0x111   :  { %728 = vst [vmem:[%s1293_s3] sm:$0xff] %v726_v36  ;;  %v725_v39 = vadd.f32 %v722_v38, %v711_v37 }
 0x113   :  { %v727_v40 = vmax.f32 %v725_v39, 0.0 }
 0x115   :  { %729 = vst [vmem:[%s1293_s3 + $0x8] sm:$0xff] %v727_v40 }

// kernel: foodnet_forward.5
= control target key start
LH: loop header
LB: loop body
LE: loop exit
PB: predicated region body
PF: predicated region fallthrough
CT: control target
= control target key end

     0   :  { %v845_v34 = vmov 0.0   ;;  %vm846_vm0 = vmmov 0   ;;  %s1076_s1 = inlined_call_operand.vmem [shape: bf16[512,128], index: 1, kind: input, shape index: {}]   ;;  %s1077_s0 = inlined_call_operand.vmem [shape: bf16[16,512], index: 0, kind: input, shape index: {}]   ;;  %s1078_s3 = inlined_call_operand.vmem [shape: bf16[128,128], index: 3, kind: input, shape index: {}]   ;;  %s1079_s5 = inlined_call_operand.vmem [shape: bf16[128,128], index: 5, kind: input, shape index: {}]   ;;  %s1080_s2 = inlined_call_operand.vmem [shape: f32[1,128], index: 2, kind: input, shape index: {}]   ;;  %s1081_s4 = inlined_call_operand.vmem [shape: f32[1,128], index: 4, kind: input, shape index: {}]   ;;  %s1082_s6 = inlined_call_operand.vmem [shape: f32[1,128], index: 6, kind: input, shape index: {}]   ;;  %s1083_s7 = inlined_call_operand.vmem [shape: f32[16,128], index: 7, kind: output, shape index: {}]  }
   0x1   :  { %v791_v0 = vld [vmem:[%s1076_s1 + $0x78] sm:$0xff]   ;;  %v795_v4 = vld [vmem:[%s1076_s1 + $0x70] sm:$0xff]   ;;  %v799_v8 = vld [vmem:[%s1076_s1 + $0x68] sm:$0xff]  }
   0x2   :  { %v792_v1 = vld [vmem:[%s1076_s1 + $0xf8] sm:$0xff]   ;;  %687 = vmatprep.subr.bf16.mxu0 %v791_v0  ;;  %v796_v5 = vld [vmem:[%s1076_s1 + $0xf0] sm:$0xff]   ;;  %v800_v9 = vld [vmem:[%s1076_s1 + $0xe8] sm:$0xff]  }
   0x3   :  { %v793_v2 = vld [vmem:[%s1076_s1 + $0x38] sm:$0xff]   ;;  %709 = vmatprep.subr.bf16.mxu1 %v792_v1  ;;  %v797_v6 = vld [vmem:[%s1076_s1 + $0x30] sm:$0xff]   ;;  %v801_v10 = vld [vmem:[%s1076_s1 + $0x28] sm:$0xff]  }
   0x4   :  { %v794_v3 = vld [vmem:[%s1076_s1 + $0xb8] sm:$0xff]   ;;  %688 = vmatpush3.bf16.msra.mxu0 %v793_v2  ;;  %v798_v7 = vld [vmem:[%s1076_s1 + $0xb0] sm:$0xff]   ;;  %v802_v11 = vld [vmem:[%s1076_s1 + $0xa8] sm:$0xff]  }
   0x5   :  { %710 = vmatpush3.bf16.msra.mxu1 %v794_v3  ;;  %689 = vmatprep.subr.bf16.mxu0 %v795_v4  ;;  %v803_v12 = vld [vmem:[%s1076_s1 + $0x60] sm:$0xff]   ;;  %v807_v16 = vld [vmem:[%s1076_s1 + $0x58] sm:$0xff]   ;;  %v811_v20 = vld [vmem:[%s1076_s1 + $0x50] sm:$0xff]  }
   0x6   :  { %711 = vmatprep.subr.bf16.mxu1 %v796_v5  ;;  %v804_v13 = vld [vmem:[%s1076_s1 + $0xe0] sm:$0xff]   ;;  %v808_v17 = vld [vmem:[%s1076_s1 + $0xd8] sm:$0xff]   ;;  %v812_v21 = vld [vmem:[%s1076_s1 + $0xd0] sm:$0xff]  }
   0x7   :  { %v805_v14 = vld [vmem:[%s1076_s1 + $0x20] sm:$0xff]   ;;  %v809_v18 = vld [vmem:[%s1076_s1 + $0x18] sm:$0xff]   ;;  %v813_v22 = vld [vmem:[%s1076_s1 + $0x10] sm:$0xff]  }
   0x8   :  { %690 = vmatpush3.bf16.msra.mxu0 %v797_v6  ;;  %v806_v15 = vld [vmem:[%s1076_s1 + $0xa0] sm:$0xff]   ;;  %v810_v19 = vld [vmem:[%s1076_s1 + $0x98] sm:$0xff]   ;;  %v814_v23 = vld [vmem:[%s1076_s1 + $0x90] sm:$0xff]  }
   0x9   :  { %712 = vmatpush3.bf16.msra.mxu1 %v798_v7  ;;  %691 = vmatprep.subr.bf16.mxu0 %v799_v8  ;;  %v815_v24 = vld [vmem:[%s1076_s1 + $0x48] sm:$0xff]   ;;  %v819_v28 = vld [vmem:[%s1076_s1 + $0x40] sm:$0xff]   ;;  %v829_v37 = vld [vmem:[%s1078_s3 + $0x38] sm:$0xff]  }
   0xa   :  { %713 = vmatprep.subr.bf16.mxu1 %v800_v9  ;;  %v816_v25 = vld [vmem:[%s1076_s1 + $0xc8] sm:$0xff]   ;;  %v820_v29 = vld [vmem:[%s1076_s1 + $0xc0] sm:$0xff]   ;;  %v830_v38 = vld [vmem:[%s1078_s3 + $0x30] sm:$0xff]  }
   0xb   :  { %v817_v26 = vld [vmem:[%s1076_s1 + $0x8] sm:$0xff]   ;;  %v821_v30 = vld [vmem:[%s1076_s1] sm:$0xff]   ;;  %v833_v41 = vld [vmem:[%s1078_s3 + $0x18] sm:$0xff]  }
   0xc   :  { %692 = vmatpush3.bf16.msra.mxu0 %v801_v10  ;;  %v818_v27 = vld [vmem:[%s1076_s1 + $0x88] sm:$0xff]   ;;  %v822_v31 = vld [vmem:[%s1076_s1 + $0x80] sm:$0xff]   ;;  %v834_v42 = vld [vmem:[%s1078_s3 + $0x10] sm:$0xff]  }
   0xd   :  { %714 = vmatpush3.bf16.msra.mxu1 %v802_v11  ;;  %693 = vmatprep.subr.bf16.mxu0 %v803_v12  ;;  %v823_v32 = vld [vmem:[%s1077_s0] ss:$16 sps:$4 sm:$0xff]   ;;  %v825_v33 = vld [vmem:[%s1077_s0 + $0x4] ss:$16 sps:$4 sm:$0xff]   ;;  %v826_v35 = vld [vmem:[%s1077_s0 + $0x8] ss:$16 sps:$4 sm:$0xff]  }
   0xe   :  { %715 = vmatprep.subr.bf16.mxu1 %v804_v13  ;;  %v828_v36 = vld [vmem:[%s1077_s0 + $0xc] ss:$16 sps:$4 sm:$0xff]   ;;  %346 = vmatprep.mubr.bf16.mxu0 %v825_v33  ;;  %v832_v40 = vld [vmem:[%s1078_s3 + $0x20] sm:$0xff]   ;;  %v838_v46 = vld [vmem:[%s1079_s5 + $0x30] sm:$0xff]  }
   0xf   :  { %387 = vmatprep.mubr.bf16.mxu1 %v828_v36  ;;  %v831_v39 = vld [vmem:[%s1078_s3 + $0x28] sm:$0xff]   ;;  %v836_v44 = vld [vmem:[%s1078_s3] sm:$0xff]   ;;  %v837_v45 = vld [vmem:[%s1079_s5 + $0x38] sm:$0xff]  }
  0x10   :  { %694 = vmatpush3.bf16.msra.mxu0 %v805_v14  ;;  %v835_v43 = vld [vmem:[%s1078_s3 + $0x8] sm:$0xff]   ;;  %v840_v48 = vld [vmem:[%s1079_s5 + $0x20] sm:$0xff]   ;;  %v841_v49 = vld [vmem:[%s1079_s5 + $0x18] sm:$0xff]  }
  0x11   :  { %716 = vmatpush3.bf16.msra.mxu1 %v806_v15  ;;  %695 = vmatprep.subr.bf16.mxu0 %v807_v16  ;;  %v839_v47 = vld [vmem:[%s1079_s5 + $0x28] sm:$0xff]   ;;  %v632_v52 = vld [vmem:[%s1080_s2] ss:$0 sm:$0xff]  ;;  %v842_v6 = vld [vmem:[%s1079_s5 + $0x10] sm:$0xff]  }
  0x12   :  { %717 = vmatprep.subr.bf16.mxu1 %v808_v17  ;;  %v843_v7 = vld [vmem:[%s1079_s5 + $0x8] sm:$0xff]   ;;  %v844_v8 = vld [vmem:[%s1079_s5] sm:$0xff]  }
  0x13   :  { %v669_v9 = vld [vmem:[%s1081_s4] ss:$0 sm:$0xff] }
  0x14   :  { %696 = vmatpush3.bf16.msra.mxu0 %v809_v18 }
  0x15   :  { %718 = vmatpush3.bf16.msra.mxu1 %v810_v19  ;;  %697 = vmatprep.subr.bf16.mxu0 %v811_v20  ;;  %v678_v19 = vld [vmem:[%s1082_s6] ss:$0 sm:$0xff] }
  0x16   :  { %719 = vmatprep.subr.bf16.mxu1 %v812_v21 }
  0x18   :  { %698 = vmatpush3.bf16.msra.mxu0 %v813_v22 }
  0x19   :  { %720 = vmatpush3.bf16.msra.mxu1 %v814_v23  ;;  %699 = vmatprep.subr.bf16.mxu0 %v815_v24 }
  0x1a   :  { %721 = vmatprep.subr.bf16.mxu1 %v816_v25 }
  0x1c   :  { %700 = vmatpush3.bf16.msra.mxu0 %v817_v26 }
  0x1d   :  { %722 = vmatpush3.bf16.msra.mxu1 %v818_v27  ;;  %701 = vmatprep.subr.bf16.mxu0 %v819_v28 }
  0x1e   :  { %723 = vmatprep.subr.bf16.mxu1 %v820_v29 }
  0x20   :  { %702 = vmatpush3.bf16.msra.mxu0 %v821_v30 }
  0x21   :  { %724 = vmatpush3.bf16.msra.mxu1 %v822_v31  ;;  %749 = vmatprep.subr.bf16.mxu0 %v845_v34 }
  0x22   :  { %769 = vmatprep.subr.bf16.mxu1 %v845_v34 }
  0x23   :  { %347 = vmatmul.mubr.bf16.vlgmr.msra.gmra.mxu0 %v823_v32 }
  0x24   :  { %388 = vmatmul.mubr.bf16.vlgmr.msra.gmra.mxu1 %v826_v35  ;;  %750 = vmatpush3.bf16.msra.mxu0 %v829_v37 }
  0x25   :  { %751 = vmatprep.subr.bf16.mxu0 %v845_v34  ;;  %765 = vmatprep.mubr.msk.bf16.mxu0 %vm846_vm0, %v845_v34 }
  0x26   :  { %785 = vmatprep.mubr.msk.bf16.mxu1 %vm846_vm0, %v845_v34  ;;  %770 = vmatpush3.bf16.msra.mxu1 %v837_v45 }
  0x27   :  { %771 = vmatprep.subr.bf16.mxu1 %v845_v34 }
  0x28   :  { %752 = vmatpush3.bf16.msra.mxu0 %v830_v38 }
  0x29   :  { %753 = vmatprep.subr.bf16.mxu0 %v845_v34 }
  0x2a   :  { %772 = vmatpush3.bf16.msra.mxu1 %v838_v46 }
  0x2b   :  { %773 = vmatprep.subr.bf16.mxu1 %v845_v34 }
  0x2c   :  { %754 = vmatpush3.bf16.msra.mxu0 %v831_v39 }
  0x2d   :  { %755 = vmatprep.subr.bf16.mxu0 %v845_v34 }
  0x2e   :  { %774 = vmatpush3.bf16.msra.mxu1 %v839_v47 }
  0x2f   :  { %775 = vmatprep.subr.bf16.mxu1 %v845_v34 }
  0x30   :  { %756 = vmatpush3.bf16.msra.mxu0 %v832_v40 }
  0x31   :  { %757 = vmatprep.subr.bf16.mxu0 %v845_v34 }
  0x32   :  { %776 = vmatpush3.bf16.msra.mxu1 %v840_v48 }
  0x33   :  { %777 = vmatprep.subr.bf16.mxu1 %v845_v34 }
  0x34   :  { %758 = vmatpush3.bf16.msra.mxu0 %v833_v41 }
  0x35   :  { %759 = vmatprep.subr.bf16.mxu0 %v845_v34 }
  0x36   :  { %778 = vmatpush3.bf16.msra.mxu1 %v841_v49 }
  0x37   :  { %779 = vmatprep.subr.bf16.mxu1 %v845_v34 }
  0x38   :  { %760 = vmatpush3.bf16.msra.mxu0 %v834_v42 }
  0x39   :  { %761 = vmatprep.subr.bf16.mxu0 %v845_v34 }
  0x3a   :  { %780 = vmatpush3.bf16.msra.mxu1 %v842_v6 }
  0x3b   :  { %781 = vmatprep.subr.bf16.mxu1 %v845_v34 }
  0x3c   :  { %762 = vmatpush3.bf16.msra.mxu0 %v835_v43 }
  0x3d   :  { %763 = vmatprep.subr.bf16.mxu0 %v845_v34 }
  0x3e   :  { %782 = vmatpush3.bf16.msra.mxu1 %v843_v7 }
  0x3f   :  { %783 = vmatprep.subr.bf16.mxu1 %v845_v34 }
  0x40   :  { %764 = vmatpush3.bf16.msra.mxu0 %v836_v44 }
  0x42   :  { %784 = vmatpush3.bf16.msra.mxu1 %v844_v8 }
  0xe3   :  { %v703_v50 = vpop.f32.mrf.mxu0 }
  0xe4   :  { %v725_v51 = vpop.f32.mrf.mxu1 }
  0xe5   :  { %v704_v53 = vpop.f32.mrf.mxu0 }
  0xe6   :  { %v705_v54 = vadd.f32 %v704_v53, %v703_v50  ;;  %v726_v55 = vpop.f32.mrf.mxu1 }
  0xe7   :  { %v706_v56 = vpop.f32.mrf.mxu0  ;;  %v727_v60 = vadd.f32 %v726_v55, %v725_v51 }
  0xe8   :  { %v349_v57 = vadd.f32 %v705_v54, %v632_v52  ;;  %v728_v58 = vpop.f32.mrf.mxu1 }
  0xe9   :  { %v707_v59 = vpop.f32.mrf.mxu0 }
  0xea   :  { %v708_v61 = vadd.f32 %v707_v59, %v706_v56  ;;  %v729_v62 = vpop.f32.mrf.mxu1  ;;  %v390_v63 = vadd.f32 %v727_v60, %v349_v57 }
  0xeb   :  { %v730_v1 = vadd.f32 %v729_v62, %v728_v58 }
  0xec   :  { %v352_v0 = vadd.f32 %v708_v61, %v632_v52  ;;  %v396_v3 = vmax.f32 %v390_v63, 0.0 }
  0xee   :  { %v393_v2 = vadd.f32 %v730_v1, %v352_v0 }
  0xf0   :  { %v397_v4 = vmax.f32 %v393_v2, 0.0 }
  0xf2   :  { %v398_v5 = vpack.c.bf16 %v397_v4, %v396_v3 }
  0xf4   :  { %766 = vmatmul.mubr.bf16.vlgmr.msra.gmra.mxu0 %v398_v5 }
 0x1b4   :  { %v504_v10 = vpop.f32.mrf.mxu0 }
 0x1b5   :  { %v505_v12 = vadd.f32 %v669_v9, %v504_v10 }
 0x1b6   :  { %v767_v11 = vpop.f32.mrf.mxu0 }
 0x1b7   :  { %v511_v16 = vmax.f32 %v505_v12, 0.0 }
 0x1b8   :  { %v507_v13 = vpop.f32.mrf.mxu0 }
 0x1b9   :  { %v508_v14 = vadd.f32 %v669_v9, %v507_v13 }
 0x1ba   :  { %v768_v15 = vpop.f32.mrf.mxu0 }
 0x1bb   :  { %v512_v17 = vmax.f32 %v508_v14, 0.0 }
 0x1bd   :  { %v513_v18 = vpack.c.bf16 %v512_v17, %v511_v16 }
 0x1bf   :  { %786 = vmatmul.mubr.bf16.vlgmr.msra.gmra.mxu1 %v513_v18 }
 0x27f   :  { %v619_v20 = vpop.f32.mrf.mxu1 }
 0x280   :  { %v620_v21 = vadd.f32 %v678_v19, %v619_v20 }
 0x281   :  { %v787_v22 = vpop.f32.mrf.mxu1 }
 0x282   :  { %626 = vst [vmem:[%s1083_s7] sm:$0xff] %v620_v21 }
 0x283   :  { %v622_v23 = vpop.f32.mrf.mxu1 }
 0x284   :  { %v623_v24 = vadd.f32 %v678_v19, %v622_v23 }
 0x285   :  { %v788_v25 = vpop.f32.mrf.mxu1 }
 0x286   :  { %627 = vst [vmem:[%s1083_s7 + $0x8] sm:$0xff] %v623_v24 }

</bundles_post_ra>
